<compile_context>
chip_gen: v7x
topology: tpu7x:2x2x1
jax: 0.10.0
libtpu: 0.0.40
codegen_flags: <defaults>
</compile_context>

<pallas_src>
import jax
import jax.numpy as jnp
from jax.experimental import pallas as pl
from jax.experimental.pallas import tpu as pltpu

K_IN = 28 * 28    # 784 flattened input features (full-extent K block)
H = 512           # hidden width
N_OUT = 10        # logical logits
N_PAD = 128       # lane-dense output width (sliced back to 10 in the wrapper)


def mlp_kernel(x_ref, w1_ref, b1_ref, w2_ref, b2_ref, w3_ref, b3_ref, o_ref):
    # x tile arrives f32 straight from HBM (no wrapper pad/cast copy); cast once
    # in VMEM so all three matmuls take the bf16 MXU path with f32 accumulation.
    x = x_ref[...].astype(jnp.bfloat16)
    # Layer 1: (TM, 784)bf16 @ (784, 512)bf16 -> f32 acc, + f32 bias, ReLU
    h1 = jnp.dot(x, w1_ref[...], preferred_element_type=jnp.float32)
    h1 = jnp.maximum(h1 + b1_ref[...], 0.0).astype(jnp.bfloat16)
    # Layer 2: (TM, 512)bf16 @ (512, 512)bf16 -> f32 acc, + f32 bias, ReLU
    h2 = jnp.dot(h1, w2_ref[...], preferred_element_type=jnp.float32)
    h2 = jnp.maximum(h2 + b2_ref[...], 0.0).astype(jnp.bfloat16)
    # Layer 3: (TM, 512)bf16 @ (512, 128)bf16 -> f32 acc, + f32 bias,
    # lane-dense 128-wide bf16 store (unmasked vst, halved writeback).
    logits = jnp.dot(h2, w3_ref[...], preferred_element_type=jnp.float32)
    o_ref[...] = (logits + b3_ref[...]).astype(o_ref.dtype)


def prepare_kernel_params(params):
    """One-time conversion of logical f32 params to kernel layout:
    weights -> bf16 (halves resident-weight DMA, native MXU dtype), biases f32,
    w3/b3 zero-padded to 128 output lanes (padded logits columns are exact zeros+bias
    and get sliced away)."""
    w1, b1, w2, b2, w3, b3 = params
    w1p = w1.astype(jnp.bfloat16)                                        # (784, 512)
    w2p = w2.astype(jnp.bfloat16)                                        # (512, 512)
    w3p = jnp.pad(w3, ((0, 0), (0, N_PAD - N_OUT))).astype(jnp.bfloat16)  # (512, 128)
    b1p = b1.astype(jnp.float32)
    b2p = b2.astype(jnp.float32)
    b3p = jnp.pad(b3, ((0, 0), (0, N_PAD - N_OUT))).astype(jnp.float32)
    return w1p, b1p, w2p, b2p, w3p, b3p


def _choose_tm(batch):
    """Rows per grid step.  Large tiles amortize the ~0.35 us/step pipeline overhead
    and fill the 256-wide MXU on v6e/v7x; when the batch allows it we keep >=2 grid
    steps so dimension_semantics=('parallel',) shards across v7x's two TensorCores."""
    b8 = -(-batch // 8) * 8                          # sublane-aligned batch
    if b8 <= 128:
        return b8                                    # tiny batch: one minimal tile
    if b8 <= 1024:
        return max(128, (-(-(b8 // 2) // 128)) * 128)  # ~2 tiles, 128-aligned
    return 512                                       # large batch: max tile, many steps


def neural_network_forward(x, kparams):
    """x: (B, 28, 28) float32.  kparams: output of prepare_kernel_params.
    Returns logits (B, 10) float32."""
    w1, b1, w2, b2, w3, b3 = kparams
    B = x.shape[0]

    # nn.Flatten (row-major, same as PyTorch). No dtype/pad round-trip of x in HBM:
    # the kernel reads the f32 rows directly and casts in VMEM.
    x_flat = x.reshape(B, K_IN)

    TM = _choose_tm(B)
    n_tiles = pl.cdiv(B, TM)
    B_pad = n_tiles * TM
    x_in = x_flat if B_pad == B else jnp.pad(x_flat, ((0, B_pad - B), (0, 0)))

    flops = 2 * B_pad * (K_IN * H + H * H + H * N_PAD)
    bytes_accessed = (x_in.size * 4                              # f32 input rows
                      + (w1.size + w2.size + w3.size) * 2        # bf16 weights
                      + (b1.size + b2.size + b3.size) * 4        # f32 biases
                      + B_pad * N_PAD * 2)                       # bf16 logits

    out = pl.pallas_call(
        mlp_kernel,
        out_shape=jax.ShapeDtypeStruct((B_pad, N_PAD), jnp.bfloat16),
        grid_spec=pltpu.PrefetchScalarGridSpec(
            num_scalar_prefetch=0,
            grid=(n_tiles,),
            in_specs=[
                pl.BlockSpec((TM, K_IN), lambda i: (i, 0)),   # x: blocked rows, full K
                pl.BlockSpec((K_IN, H), lambda i: (0, 0)),    # w1: VMEM-resident
                pl.BlockSpec((1, H), lambda i: (0, 0)),       # b1
                pl.BlockSpec((H, H), lambda i: (0, 0)),       # w2
                pl.BlockSpec((1, H), lambda i: (0, 0)),       # b2
                pl.BlockSpec((H, N_PAD), lambda i: (0, 0)),   # w3
                pl.BlockSpec((1, N_PAD), lambda i: (0, 0)),   # b3
            ],
            out_specs=pl.BlockSpec((TM, N_PAD), lambda i: (i, 0)),
        ),
        compiler_params=pltpu.CompilerParams(
            dimension_semantics=("parallel",),
            vmem_limit_bytes=16 * 1024 * 1024,   # footprint < ~10 MiB even at TM=512
        ),
        cost_estimate=pl.CostEstimate(
            flops=flops, transcendentals=0, bytes_accessed=bytes_accessed),
    )(x_in, w1, b1, w2, b2, w3, b3)

    return out[:B, :N_OUT].astype(jnp.float32)


def init_params(key):
    """Deterministic init mimicking nn.Linear default U(-1/sqrt(fan_in), 1/sqrt(fan_in)).
    Weights stored as (in_features, out_features) (already transposed), f32."""
    dims = [(K_IN, H), (H, H), (H, N_OUT)]
    params = []
    for i, (fan_in, fan_out) in enumerate(dims):
        kw, kb = jax.random.split(jax.random.fold_in(key, i))
        bound = 1.0 / (fan_in ** 0.5)
        w = jax.random.uniform(kw, (fan_in, fan_out), jnp.float32, -bound, bound)
        b = jax.random.uniform(kb, (1, fan_out), jnp.float32, -bound, bound)
        params += [w, b]
    return tuple(params)


def reference_forward(x, params):
    """Pure-JAX reference with the same bf16 rounding / f32 accumulation as the kernel."""
    w1, b1, w2, b2, w3, b3 = params
    xf = x.reshape(x.shape[0], -1).astype(jnp.bfloat16)
    r = jnp.dot(xf, w1.astype(jnp.bfloat16), preferred_element_type=jnp.float32)
    r = jnp.maximum(r + b1, 0.0).astype(jnp.bfloat16)
    r = jnp.dot(r, w2.astype(jnp.bfloat16), preferred_element_type=jnp.float32)
    r = jnp.maximum(r + b2, 0.0).astype(jnp.bfloat16)
    r = jnp.dot(r, w3.astype(jnp.bfloat16), preferred_element_type=jnp.float32) + b3
    return r.astype(jnp.bfloat16).astype(jnp.float32)   # kernel stores logits as bf16


if __name__ == "__main__":
    key = jax.random.PRNGKey(0)
    k_x, k_p = jax.random.split(key)

    params = init_params(k_p)
    kparams = prepare_kernel_params(params)

    # Small batch (like torch.rand(B, 28, 28)) -> single minimal tile path.
    B = 4
    x = jax.random.uniform(k_x, (B, 28, 28), jnp.float32)
    logits = neural_network_forward(x, kparams)
    jax.block_until_ready(logits)
    assert logits.shape == (B, N_OUT) and logits.dtype == jnp.float32
    ref = reference_forward(x, params)
    assert jnp.allclose(logits, ref, atol=2e-2, rtol=2e-2)

    # Moderate batch -> exercises the multi-tile (2-step, 128-aligned) grid path.
    B2 = 260
    x2 = jax.random.uniform(jax.random.fold_in(k_x, 1), (B2, 28, 28), jnp.float32)
    logits2 = neural_network_forward(x2, kparams)
    jax.block_until_ready(logits2)
    assert logits2.shape == (B2, N_OUT)
    ref2 = reference_forward(x2, params)
    assert jnp.allclose(logits2, ref2, atol=2e-2, rtol=2e-2)

    print("KERNEL_OK")
</pallas_src>

<mosaic_0001>
module attributes {stable_mosaic.version = 11 : i64} {
  func.func @mlp_kernel(%arg0: i32, %arg1: memref<8x784xf32, #tpu.memory_space<vmem>>, %arg2: memref<784x512xbf16, #tpu.memory_space<vmem>>, %arg3: memref<1x512xf32, #tpu.memory_space<vmem>>, %arg4: memref<512x512xbf16, #tpu.memory_space<vmem>>, %arg5: memref<1x512xf32, #tpu.memory_space<vmem>>, %arg6: memref<512x128xbf16, #tpu.memory_space<vmem>>, %arg7: memref<1x128xf32, #tpu.memory_space<vmem>>, %arg8: memref<8x128xbf16, #tpu.memory_space<vmem>>) attributes {dimension_semantics = [#tpu.dimension_semantics<parallel>], iteration_bounds = array<i64: 1>, scalar_prefetch = 0 : i64, scratch_operands = 0 : i64, tpu.core_type = #tpu.core_type<tc>, window_params = [{transform_indices = @transform_0, window_bounds = array<i64: 8, 784>}, {pipeline_mode = #tpu.pipeline_mode<synchronous>, transform_indices = @transform_1, window_bounds = array<i64: 784, 512>}, {pipeline_mode = #tpu.pipeline_mode<synchronous>, transform_indices = @transform_2, window_bounds = array<i64: 1, 512>}, {pipeline_mode = #tpu.pipeline_mode<synchronous>, transform_indices = @transform_3, window_bounds = array<i64: 512, 512>}, {pipeline_mode = #tpu.pipeline_mode<synchronous>, transform_indices = @transform_4, window_bounds = array<i64: 1, 512>}, {pipeline_mode = #tpu.pipeline_mode<synchronous>, transform_indices = @transform_5, window_bounds = array<i64: 512, 128>}, {pipeline_mode = #tpu.pipeline_mode<synchronous>, transform_indices = @transform_6, window_bounds = array<i64: 1, 128>}, {transform_indices = @transform_7, window_bounds = array<i64: 8, 128>}]} {
    %c0 = arith.constant 0 : index
    %c0_0 = arith.constant 0 : index
    %0 = vector.load %arg1[%c0, %c0_0] : memref<8x784xf32, #tpu.memory_space<vmem>>, vector<8x784xf32>
    %1 = arith.truncf %0 : vector<8x784xf32> to vector<8x784xbf16>
    %c0_1 = arith.constant 0 : index
    %c0_2 = arith.constant 0 : index
    %2 = vector.load %arg2[%c0_1, %c0_2] : memref<784x512xbf16, #tpu.memory_space<vmem>>, vector<784x512xbf16>
    %cst = arith.constant dense<0.000000e+00> : vector<8x512xf32>
    %3 = tpu.matmul %1, %2, %cst {dimension_numbers = #tpu.dot_dimension_numbers<[1], [0], [0], [1], [0, 0, 1, 1], [], []>} : vector<8x784xbf16>, vector<784x512xbf16>, vector<8x512xf32> -> vector<8x512xf32>
    %c0_3 = arith.constant 0 : index
    %c0_4 = arith.constant 0 : index
    %4 = vector.load %arg3[%c0_3, %c0_4] : memref<1x512xf32, #tpu.memory_space<vmem>>, vector<1x512xf32>
    %5 = vector.broadcast %4 : vector<1x512xf32> to vector<8x512xf32>
    %6 = arith.addf %3, %5 : vector<8x512xf32>
    %cst_5 = arith.constant 0.000000e+00 : f32
    %7 = vector.broadcast %cst_5 : f32 to vector<8x512xf32>
    %8 = arith.maximumf %6, %7 : vector<8x512xf32>
    %9 = arith.truncf %8 : vector<8x512xf32> to vector<8x512xbf16>
    %c0_6 = arith.constant 0 : index
    %c0_7 = arith.constant 0 : index
    %10 = vector.load %arg4[%c0_6, %c0_7] : memref<512x512xbf16, #tpu.memory_space<vmem>>, vector<512x512xbf16>
    %cst_8 = arith.constant dense<0.000000e+00> : vector<8x512xf32>
    %11 = tpu.matmul %9, %10, %cst_8 {dimension_numbers = #tpu.dot_dimension_numbers<[1], [0], [0], [1], [0, 0, 1, 1], [], []>} : vector<8x512xbf16>, vector<512x512xbf16>, vector<8x512xf32> -> vector<8x512xf32>
    %c0_9 = arith.constant 0 : index
    %c0_10 = arith.constant 0 : index
    %12 = vector.load %arg5[%c0_9, %c0_10] : memref<1x512xf32, #tpu.memory_space<vmem>>, vector<1x512xf32>
    %13 = vector.broadcast %12 : vector<1x512xf32> to vector<8x512xf32>
    %14 = arith.addf %11, %13 : vector<8x512xf32>
    %cst_11 = arith.constant 0.000000e+00 : f32
    %15 = vector.broadcast %cst_11 : f32 to vector<8x512xf32>
    %16 = arith.maximumf %14, %15 : vector<8x512xf32>
    %17 = arith.truncf %16 : vector<8x512xf32> to vector<8x512xbf16>
    %c0_12 = arith.constant 0 : index
    %c0_13 = arith.constant 0 : index
    %18 = vector.load %arg6[%c0_12, %c0_13] : memref<512x128xbf16, #tpu.memory_space<vmem>>, vector<512x128xbf16>
    %cst_14 = arith.constant dense<0.000000e+00> : vector<8x128xf32>
    %19 = tpu.matmul %17, %18, %cst_14 {dimension_numbers = #tpu.dot_dimension_numbers<[1], [0], [0], [1], [0, 0, 1, 1], [], []>} : vector<8x512xbf16>, vector<512x128xbf16>, vector<8x128xf32> -> vector<8x128xf32>
    %c0_15 = arith.constant 0 : index
    %c0_16 = arith.constant 0 : index
    %20 = vector.load %arg7[%c0_15, %c0_16] : memref<1x128xf32, #tpu.memory_space<vmem>>, vector<1x128xf32>
    %21 = vector.broadcast %20 : vector<1x128xf32> to vector<8x128xf32>
    %22 = arith.addf %19, %21 : vector<8x128xf32>
    %23 = arith.truncf %22 : vector<8x128xf32> to vector<8x128xbf16>
    %c0_17 = arith.constant 0 : index
    %c0_18 = arith.constant 0 : index
    %24 = vector.load %arg8[%c0_17, %c0_18] : memref<8x128xbf16, #tpu.memory_space<vmem>>, vector<8x128xbf16>
    tpu.vector_store %arg8[%c0_17, %c0_18], %23 {strides = array<i32>} : memref<8x128xbf16, #tpu.memory_space<vmem>>, vector<8x128xbf16>,
    return
  }
  func.func @transform_0(%arg0: i32) -> (i32, i32) {
    %c0_i32 = arith.constant 0 : i32
    %c0_i32_0 = arith.constant 0 : i32
    return %arg0, %c0_i32 : i32, i32
  }
  func.func @transform_1(%arg0: i32) -> (i32, i32) {
    %c0_i32 = arith.constant 0 : i32
    %c0_i32_0 = arith.constant 0 : i32
    %c0_i32_1 = arith.constant 0 : i32
    return %c0_i32, %c0_i32_0 : i32, i32
  }
  func.func @transform_2(%arg0: i32) -> (i32, i32) {
    %c0_i32 = arith.constant 0 : i32
    %c0_i32_0 = arith.constant 0 : i32
    %c0_i32_1 = arith.constant 0 : i32
    return %c0_i32, %c0_i32_0 : i32, i32
  }
  func.func @transform_3(%arg0: i32) -> (i32, i32) {
    %c0_i32 = arith.constant 0 : i32
    %c0_i32_0 = arith.constant 0 : i32
    %c0_i32_1 = arith.constant 0 : i32
    return %c0_i32, %c0_i32_0 : i32, i32
  }
  func.func @transform_4(%arg0: i32) -> (i32, i32) {
    %c0_i32 = arith.constant 0 : i32
    %c0_i32_0 = arith.constant 0 : i32
    %c0_i32_1 = arith.constant 0 : i32
    return %c0_i32, %c0_i32_0 : i32, i32
  }
  func.func @transform_5(%arg0: i32) -> (i32, i32) {
    %c0_i32 = arith.constant 0 : i32
    %c0_i32_0 = arith.constant 0 : i32
    %c0_i32_1 = arith.constant 0 : i32
    return %c0_i32, %c0_i32_0 : i32, i32
  }
  func.func @transform_6(%arg0: i32) -> (i32, i32) {
    %c0_i32 = arith.constant 0 : i32
    %c0_i32_0 = arith.constant 0 : i32
    %c0_i32_1 = arith.constant 0 : i32
    return %c0_i32, %c0_i32_0 : i32, i32
  }
  func.func @transform_7(%arg0: i32) -> (i32, i32) {
    %c0_i32 = arith.constant 0 : i32
    %c0_i32_0 = arith.constant 0 : i32
    return %arg0, %c0_i32 : i32, i32
  }
}

</mosaic_0001>

<bundles_post_ra>
// kernel: tpu_custom_call.1
= control target key start
LH: loop header
LB: loop body
LE: loop exit
PB: predicated region body
PF: predicated region fallthrough
CT: control target
= control target key end

     0   :  { %12 = vsyncpa [#allocation3], 0  ;;  %s4202_s0 = inlined_call_operand.hbm [shape: f32[8,784], index: 0, kind: input, shape index: {}]   ;;  %s4203_s1 = inlined_call_operand.hbm [shape: bf16[784,512], index: 1, kind: input, shape index: {}]   ;;  %s4204_s2 = inlined_call_operand.vmem [shape: f32[1,512], index: 2, kind: input, shape index: {}]   ;;  %s4205_s3 = inlined_call_operand.hbm [shape: bf16[512,512], index: 3, kind: input, shape index: {}]   ;;  %s4206_s4 = inlined_call_operand.vmem [shape: f32[1,512], index: 4, kind: input, shape index: {}]   ;;  %s4207_s5 = inlined_call_operand.hbm [shape: bf16[512,128], index: 5, kind: input, shape index: {}]   ;;  %s4208_s6 = inlined_call_operand.vmem [shape: f32[1,128], index: 6, kind: input, shape index: {}]   ;;  %s4209_s7 = inlined_call_operand.hbm [shape: bf16[8,128], index: 7, kind: output, shape index: {}]  }
   0x1   :  { %13 = vsyncpa [#allocation6], 0 }
   0x2   :  { %14 = vsyncpa [#allocation9], 0 }
   0x3   :  { %15 = vsyncpa [#allocation4], 0  ;;  %s4046_s24 = smov [#allocation5]   ;;  %s3928_s28 = scalar_lea.hbm %s4203_s1, 25088 }
   0x4   :  { %s31_s25 = sshll.u32 %s4046_s24, 4  ;;  %p3929_p0 = scmp.ne.s32.totalorder %s4203_s1, %s3928_s28  ;;  %s32_s25 = int_to_ptr.vmem [resolvable:$true] %s31_s25 }
   0x5   :  { %p3932_p1 = scmp.lt.u32.totalorder %s3928_s28, %s4203_s1 }
   0x7   :  { %p3934_p2 = pnand %p3932_p1, %p3929_p0 }
   0x9   :  { %3937 = shalt.err (!%p3934_p2)
}
   0xa   :  { %s3938_s10 = scalar_lea.vmem %s32_s25, 25088  ;;  %p3943_p4 = scmp.lt.s32.totalorder %s32_s25, %s32_s25 }
   0xb   :  { %p3939_p3 = scmp.ne.s32.totalorder %s32_s25, %s3938_s10  ;;  %p3944_p5 = scmp.lt.s32.totalorder %s3938_s10, %s3938_s10 }
   0xd   :  { %p3945_p6 = por %p3944_p5, %p3943_p4 }
   0xf   :  { %p3946_p7 = pnand %p3945_p6, %p3939_p3 }
  0x11   :  { %3949 = shalt.err (!%p3946_p7)
}
  0x12   :  { %s4047_s11 = smov 256   ;;  %s4048_s12 = smov 16  }
  0x13   :  { %37 = dma.hbm_to_vmem [thread:$0]  %s4203_s1, 25088, %s32_s25, [#allocation6], %s4047_s11, %s4047_s11, %s4048_s12  }
  0x14   :  { %s4049_s15 = smov [#allocation2]   ;;  %s4050_s17 = smov [#allocation7]  }
  0x15   :  { %s22_s16 = sshll.u32 %s4049_s15, 4  ;;  %s45_s18 = sshll.u32 %s4050_s17, 4  ;;  %s23_s16 = int_to_ptr.vmem [resolvable:$true] %s22_s16  ;;  %s46_s18 = int_to_ptr.vmem [resolvable:$true] %s45_s18 }
  0x16   :  { %s3950_s21 = scalar_lea.hbm %s4202_s0, 896 }
  0x17   :  { %p3951_p8 = scmp.ne.s32.totalorder %s4202_s0, %s3950_s21  ;;  %p3954_p9 = scmp.lt.u32.totalorder %s3950_s21, %s4202_s0 }
  0x19   :  { %p3956_p10 = pnand %p3954_p9, %p3951_p8 }
  0x1b   :  { %3959 = shalt.err (!%p3956_p10)
}
  0x1c   :  { %s3960_s1 = scalar_lea.vmem %s23_s16, 896  ;;  %p3965_p12 = scmp.lt.s32.totalorder %s23_s16, %s23_s16 }
  0x1d   :  { %p3961_p11 = scmp.ne.s32.totalorder %s23_s16, %s3960_s1  ;;  %p3966_p13 = scmp.lt.s32.totalorder %s3960_s1, %s3960_s1 }
  0x1f   :  { %p3967_p0 = por %p3966_p13, %p3965_p12 }
  0x21   :  { %p3968_p1 = pnand %p3967_p0, %p3961_p11 }
  0x23   :  { %3971 = shalt.err (!%p3968_p1)
}
  0x24   :  { %25 = dma.hbm_to_vmem [thread:$0]  %s4202_s0, 896, %s23_s16, [#allocation3]  }
  0x25   :  { %s3972_s30 = scalar_lea.hbm %s4205_s3, 16384 }
  0x26   :  { %p3973_p2 = scmp.ne.s32.totalorder %s4205_s3, %s3972_s30  ;;  %p3976_p3 = scmp.lt.u32.totalorder %s3972_s30, %s4205_s3 }
  0x28   :  { %p3978_p4 = pnand %p3976_p3, %p3973_p2 }
  0x2a   :  { %3981 = shalt.err (!%p3978_p4)
}
  0x2b   :  { %s3982_s14 = scalar_lea.vmem %s46_s18, 16384  ;;  %p3987_p6 = scmp.lt.s32.totalorder %s46_s18, %s46_s18 }
  0x2c   :  { %p3983_p5 = scmp.ne.s32.totalorder %s46_s18, %s3982_s14  ;;  %p3988_p7 = scmp.lt.s32.totalorder %s3982_s14, %s3982_s14 }
  0x2e   :  { %p3989_p8 = por %p3988_p7, %p3987_p6 }
  0x30   :  { %p3990_p9 = pnand %p3989_p8, %p3983_p5 }
  0x32   :  { %3993 = shalt.err (!%p3990_p9)
}
  0x33   :  { %51 = dma.hbm_to_vmem [thread:$0]  %s4205_s3, 16384, %s46_s18, [#allocation6], %s4047_s11, %s4047_s11, %s4048_s12  }
  0x34   :  { %s4051_s16 = smov [#allocation8]   ;;  %s3994_s21 = scalar_lea.hbm %s4207_s5, 4096 }
  0x35   :  { %s59_s17 = sshll.u32 %s4051_s16, 4  ;;  %p3995_p10 = scmp.ne.s32.totalorder %s4207_s5, %s3994_s21  ;;  %s60_s17 = int_to_ptr.vmem [resolvable:$true] %s59_s17 }
  0x36   :  { %p3998_p11 = scmp.lt.u32.totalorder %s3994_s21, %s4207_s5 }
  0x38   :  { %p4000_p12 = pnand %p3998_p11, %p3995_p10 }
  0x3a   :  { %4003 = shalt.err (!%p4000_p12)
}
  0x3b   :  { %s4004_s1 = scalar_lea.vmem %s60_s17, 4096  ;;  %p4009_p0 = scmp.lt.s32.totalorder %s60_s17, %s60_s17 }
  0x3c   :  { %p4005_p13 = scmp.ne.s32.totalorder %s60_s17, %s4004_s1  ;;  %p4010_p1 = scmp.lt.s32.totalorder %s4004_s1, %s4004_s1 }
  0x3e   :  { %p4011_p2 = por %p4010_p1, %p4009_p0 }
  0x40   :  { %p4012_p3 = pnand %p4011_p2, %p4005_p13 }
  0x42   :  { %4015 = shalt.err (!%p4012_p3)
}
  0x43   :  { %s4052_s3 = smov 64   ;;  %s4053_s11 = smov 4  }
  0x44   :  { %65 = dma.hbm_to_vmem [thread:$0]  %s4207_s5, 4096, %s60_s17, [#allocation9], %s4052_s3, %s4052_s3, %s4053_s11  }
  0x45   :  { %4038 = dma.done.wait [#allocation3], 896  }
  0x46   :  { %4039 = vsyncadd [#allocation3], 4294966400 }
  0x47   :  { %4040 = dma.done.wait [#allocation6], 41472  }
  0x48   :  { %4041 = vsyncadd [#allocation6], 4294925824 }
  0x49   :  { %4042 = dma.done.wait [#allocation9], 4096  }
  0x4a   :  { %4043 = vsyncadd [#allocation9], 4294963200  ;;  %v3410_v0 = vld [vmem:[#allocation5 + $0x4] ss:$16 sps:$4 sm:$0xff]   ;;  %v3412_v1 = vld [vmem:[#allocation5 + $0xc] ss:$16 sps:$4 sm:$0xff]  }
  0x4b   :  { %1297 = vmatprep.subr.bf16.mxu0 %v3410_v0  ;;  %v3414_v2 = vld [vmem:[#allocation5] ss:$16 sps:$4 sm:$0xff]   ;;  %v3415_v3 = vld [vmem:[#allocation5 + $0x8] ss:$16 sps:$4 sm:$0xff]   ;;  %1461 = vmatprep.subr.bf16.mxu1 %v3412_v1  ;;  %v3416_v4 = vld [vmem:[#allocation5 + $0x24] ss:$16 sps:$4 sm:$0xff]  }
  0x4c   :  { %1298 = vmatpush1.bf16.msra.mxu0 %v3414_v2  ;;  %1462 = vmatpush1.bf16.msra.mxu1 %v3415_v3  ;;  %v3418_v5 = vld [vmem:[#allocation5 + $0x2c] ss:$16 sps:$4 sm:$0xff]   ;;  %v3420_v6 = vld [vmem:[#allocation5 + $0x20] ss:$16 sps:$4 sm:$0xff]   ;;  %v3421_v7 = vld [vmem:[#allocation5 + $0x28] ss:$16 sps:$4 sm:$0xff]  }
  0x4d   :  { %1299 = vmatprep.subr.bf16.mxu0 %v3416_v4  ;;  %1463 = vmatprep.subr.bf16.mxu1 %v3418_v5  ;;  %v3422_v8 = vld [vmem:[#allocation5 + $0x44] ss:$16 sps:$4 sm:$0xff]   ;;  %v3424_v9 = vld [vmem:[#allocation5 + $0x4c] ss:$16 sps:$4 sm:$0xff]   ;;  %v3426_v10 = vld [vmem:[#allocation5 + $0x40] ss:$16 sps:$4 sm:$0xff]  }
  0x4e   :  { %v3427_v11 = vld [vmem:[#allocation5 + $0x48] ss:$16 sps:$4 sm:$0xff]   ;;  %v3428_v12 = vld [vmem:[#allocation5 + $0x64] ss:$16 sps:$4 sm:$0xff]   ;;  %v3430_v13 = vld [vmem:[#allocation5 + $0x6c] ss:$16 sps:$4 sm:$0xff]  }
  0x4f   :  { %v3432_v14 = vld [vmem:[#allocation5 + $0x60] ss:$16 sps:$4 sm:$0xff]   ;;  %v3433_v15 = vld [vmem:[#allocation5 + $0x68] ss:$16 sps:$4 sm:$0xff]   ;;  %v3434_v16 = vld [vmem:[#allocation5 + $0x84] ss:$16 sps:$4 sm:$0xff]  }
  0x50   :  { %1300 = vmatpush1.bf16.msra.mxu0 %v3420_v6  ;;  %1464 = vmatpush1.bf16.msra.mxu1 %v3421_v7  ;;  %v3436_v17 = vld [vmem:[#allocation5 + $0x8c] ss:$16 sps:$4 sm:$0xff]   ;;  %v3438_v18 = vld [vmem:[#allocation5 + $0x80] ss:$16 sps:$4 sm:$0xff]   ;;  %v3439_v19 = vld [vmem:[#allocation5 + $0x88] ss:$16 sps:$4 sm:$0xff]  }
  0x51   :  { %1301 = vmatprep.subr.bf16.mxu0 %v3422_v8  ;;  %1465 = vmatprep.subr.bf16.mxu1 %v3424_v9  ;;  %v3440_v20 = vld [vmem:[#allocation5 + $0xa4] ss:$16 sps:$4 sm:$0xff]   ;;  %v3442_v21 = vld [vmem:[#allocation5 + $0xac] ss:$16 sps:$4 sm:$0xff]   ;;  %v3444_v22 = vld [vmem:[#allocation5 + $0xa0] ss:$16 sps:$4 sm:$0xff]  }
  0x52   :  { %v3445_v23 = vld [vmem:[#allocation5 + $0xa8] ss:$16 sps:$4 sm:$0xff]   ;;  %v3446_v24 = vld [vmem:[#allocation5 + $0xc4] ss:$16 sps:$4 sm:$0xff]   ;;  %v3448_v25 = vld [vmem:[#allocation5 + $0xcc] ss:$16 sps:$4 sm:$0xff]  }
  0x53   :  { %v3450_v26 = vld [vmem:[#allocation5 + $0xc0] ss:$16 sps:$4 sm:$0xff]   ;;  %v3451_v27 = vld [vmem:[#allocation5 + $0xc8] ss:$16 sps:$4 sm:$0xff]   ;;  %v3452_v28 = vld [vmem:[#allocation5 + $0xe4] ss:$16 sps:$4 sm:$0xff]  }
  0x54   :  { %1302 = vmatpush1.bf16.msra.mxu0 %v3426_v10  ;;  %1466 = vmatpush1.bf16.msra.mxu1 %v3427_v11  ;;  %v3454_v29 = vld [vmem:[#allocation5 + $0xec] ss:$16 sps:$4 sm:$0xff]   ;;  %v3456_v30 = vld [vmem:[#allocation5 + $0xe0] ss:$16 sps:$4 sm:$0xff]   ;;  %v3457_v31 = vld [vmem:[#allocation5 + $0xe8] ss:$16 sps:$4 sm:$0xff]  }
  0x55   :  { %1303 = vmatprep.subr.bf16.mxu0 %v3428_v12  ;;  %1467 = vmatprep.subr.bf16.mxu1 %v3430_v13  ;;  %v3458_v32 = vld [vmem:[#allocation5 + $0x104] ss:$16 sps:$4 sm:$0xff]   ;;  %v3460_v33 = vld [vmem:[#allocation5 + $0x10c] ss:$16 sps:$4 sm:$0xff]   ;;  %v3462_v34 = vld [vmem:[#allocation5 + $0x100] ss:$16 sps:$4 sm:$0xff]  }
  0x56   :  { %v3463_v35 = vld [vmem:[#allocation5 + $0x108] ss:$16 sps:$4 sm:$0xff]   ;;  %v3464_v36 = vld [vmem:[#allocation5 + $0x124] ss:$16 sps:$4 sm:$0xff]   ;;  %v3466_v37 = vld [vmem:[#allocation5 + $0x12c] ss:$16 sps:$4 sm:$0xff]  }
  0x57   :  { %v3468_v38 = vld [vmem:[#allocation5 + $0x120] ss:$16 sps:$4 sm:$0xff]   ;;  %v3469_v39 = vld [vmem:[#allocation5 + $0x128] ss:$16 sps:$4 sm:$0xff]   ;;  %v3470_v40 = vld [vmem:[#allocation5 + $0x144] ss:$16 sps:$4 sm:$0xff]  }
  0x58   :  { %1304 = vmatpush1.bf16.msra.mxu0 %v3432_v14  ;;  %1468 = vmatpush1.bf16.msra.mxu1 %v3433_v15  ;;  %v3472_v41 = vld [vmem:[#allocation5 + $0x14c] ss:$16 sps:$4 sm:$0xff]   ;;  %v3474_v42 = vld [vmem:[#allocation5 + $0x140] ss:$16 sps:$4 sm:$0xff]   ;;  %v3475_v43 = vld [vmem:[#allocation5 + $0x148] ss:$16 sps:$4 sm:$0xff]  }
  0x59   :  { %1305 = vmatprep.subr.bf16.mxu0 %v3434_v16  ;;  %1469 = vmatprep.subr.bf16.mxu1 %v3436_v17  ;;  %v3476_v44 = vld [vmem:[#allocation5 + $0x164] ss:$16 sps:$4 sm:$0xff]   ;;  %v3478_v45 = vld [vmem:[#allocation5 + $0x16c] ss:$16 sps:$4 sm:$0xff]   ;;  %v3480_v47 = vld [vmem:[#allocation5 + $0x160] ss:$16 sps:$4 sm:$0xff]  }
  0x5a   :  { %v82_v46 = vld [vmem:[#allocation2 + $0x8] sm:$0xff]  ;;  %v3481_v49 = vld [vmem:[#allocation5 + $0x168] ss:$16 sps:$4 sm:$0xff]   ;;  %v3484_v51 = vld [vmem:[#allocation5 + $0x18c] ss:$16 sps:$4 sm:$0xff]   ;;  %vm1293_vm0 = vcmask 130048  }
  0x5b   :  { %v89_v48 = vpack.c.bf16 %v82_v46, %v82_v46  ;;  %v3482_v50 = vld [vmem:[#allocation5 + $0x184] ss:$16 sps:$4 sm:$0xff]   ;;  %v3486_v52 = vld [vmem:[#allocation5 + $0x180] ss:$16 sps:$4 sm:$0xff]   ;;  %v3487_v53 = vld [vmem:[#allocation5 + $0x188] ss:$16 sps:$4 sm:$0xff]  }
  0x5c   :  { %1306 = vmatpush1.bf16.msra.mxu0 %v3438_v18  ;;  %1470 = vmatpush1.bf16.msra.mxu1 %v3439_v19  ;;  %v3488_v54 = vld [vmem:[#allocation5 + $0x1a4] ss:$16 sps:$4 sm:$0xff]   ;;  %v3490_v55 = vld [vmem:[#allocation5 + $0x1ac] ss:$16 sps:$4 sm:$0xff]   ;;  %v3492_v56 = vld [vmem:[#allocation5 + $0x1a0] ss:$16 sps:$4 sm:$0xff]  }
  0x5d   :  { %1307 = vmatprep.subr.bf16.mxu0 %v3440_v20  ;;  %1471 = vmatprep.subr.bf16.mxu1 %v3442_v21  ;;  %v3493_v57 = vld [vmem:[#allocation5 + $0x1a8] ss:$16 sps:$4 sm:$0xff]   ;;  %v3494_v58 = vld [vmem:[#allocation5 + $0x1c4] ss:$16 sps:$4 sm:$0xff]   ;;  %v3496_v59 = vld [vmem:[#allocation5 + $0x1cc] ss:$16 sps:$4 sm:$0xff]  }
  0x5e   :  { %1329 = vmatprep.mubr.bf16.mxu0 %v89_v48  ;;  %1493 = vmatprep.mubr.bf16.mxu1 %v89_v48  ;;  %v3498_v60 = vld [vmem:[#allocation5 + $0x1c0] ss:$16 sps:$4 sm:$0xff]   ;;  %v3499_v61 = vld [vmem:[#allocation5 + $0x1c8] ss:$16 sps:$4 sm:$0xff]   ;;  %v3500_v62 = vld [vmem:[#allocation5 + $0x1e4] ss:$16 sps:$4 sm:$0xff]  }
  0x5f   :  { %v3502_v63 = vld [vmem:[#allocation5 + $0x1ec] ss:$16 sps:$4 sm:$0xff]   ;;  %v3504_v0 = vld [vmem:[#allocation5 + $0x1e0] ss:$16 sps:$4 sm:$0xff]   ;;  %v3505_v1 = vld [vmem:[#allocation5 + $0x1e8] ss:$16 sps:$4 sm:$0xff]  }
  0x60   :  { %1308 = vmatpush1.bf16.msra.mxu0 %v3444_v22  ;;  %1472 = vmatpush1.bf16.msra.mxu1 %v3445_v23  ;;  %v81_v2 = vld [vmem:[#allocation2] sm:$0xff]  ;;  %v3508_v3 = vld [vmem:[#allocation5 + $0x204] ss:$16 sps:$4 sm:$0xff]   ;;  %v3506_v6 = vld [vmem:[#allocation5 + $0x200] ss:$16 sps:$4 sm:$0xff]   ;;  %s4055_s29 = smov [#allocation10]  }
  0x61   :  { %1309 = vmatprep.subr.bf16.mxu0 %v3446_v24  ;;  %1473 = vmatprep.subr.bf16.mxu1 %v3448_v25  ;;  %v3511_v4 = vld [vmem:[#allocation5 + $0x20c] ss:$16 sps:$4 sm:$0xff]   ;;  %v88_v5 = vpack.c.bf16 %v81_v2, %v81_v2  ;;  %v3509_v7 = vld [vmem:[#allocation5 + $0x208] ss:$16 sps:$4 sm:$0xff]   ;;  %v3514_v8 = vld [vmem:[#allocation5 + $0x224] ss:$16 sps:$4 sm:$0xff]  }
  0x62   :  { %v3517_v9 = vld [vmem:[#allocation5 + $0x22c] ss:$16 sps:$4 sm:$0xff]   ;;  %v3512_v10 = vld [vmem:[#allocation5 + $0x220] ss:$16 sps:$4 sm:$0xff]   ;;  %v3515_v11 = vld [vmem:[#allocation5 + $0x228] ss:$16 sps:$4 sm:$0xff]  }
  0x63   :  { %v3520_v12 = vld [vmem:[#allocation5 + $0x244] ss:$16 sps:$4 sm:$0xff]   ;;  %v3523_v13 = vld [vmem:[#allocation5 + $0x24c] ss:$16 sps:$4 sm:$0xff]   ;;  %v3518_v14 = vld [vmem:[#allocation5 + $0x240] ss:$16 sps:$4 sm:$0xff]  }
  0x64   :  { %1310 = vmatpush1.bf16.msra.mxu0 %v3450_v26  ;;  %1474 = vmatpush1.bf16.msra.mxu1 %v3451_v27  ;;  %v3521_v15 = vld [vmem:[#allocation5 + $0x248] ss:$16 sps:$4 sm:$0xff]   ;;  %v3526_v16 = vld [vmem:[#allocation5 + $0x264] ss:$16 sps:$4 sm:$0xff]   ;;  %v3529_v17 = vld [vmem:[#allocation5 + $0x26c] ss:$16 sps:$4 sm:$0xff]  }
  0x65   :  { %1311 = vmatprep.subr.bf16.mxu0 %v3452_v28  ;;  %1475 = vmatprep.subr.bf16.mxu1 %v3454_v29  ;;  %v3524_v18 = vld [vmem:[#allocation5 + $0x260] ss:$16 sps:$4 sm:$0xff]   ;;  %v3527_v19 = vld [vmem:[#allocation5 + $0x268] ss:$16 sps:$4 sm:$0xff]   ;;  %v3532_v20 = vld [vmem:[#allocation5 + $0x284] ss:$16 sps:$4 sm:$0xff]  }
  0x66   :  { %v3535_v21 = vld [vmem:[#allocation5 + $0x28c] ss:$16 sps:$4 sm:$0xff]   ;;  %v3530_v22 = vld [vmem:[#allocation5 + $0x280] ss:$16 sps:$4 sm:$0xff]   ;;  %v3533_v23 = vld [vmem:[#allocation5 + $0x288] ss:$16 sps:$4 sm:$0xff]  }
  0x67   :  { %v3538_v24 = vld [vmem:[#allocation5 + $0x2a4] ss:$16 sps:$4 sm:$0xff]   ;;  %v3541_v25 = vld [vmem:[#allocation5 + $0x2ac] ss:$16 sps:$4 sm:$0xff]   ;;  %v3536_v26 = vld [vmem:[#allocation5 + $0x2a0] ss:$16 sps:$4 sm:$0xff]  }
  0x68   :  { %1312 = vmatpush1.bf16.msra.mxu0 %v3456_v30  ;;  %1476 = vmatpush1.bf16.msra.mxu1 %v3457_v31  ;;  %v3539_v27 = vld [vmem:[#allocation5 + $0x2a8] ss:$16 sps:$4 sm:$0xff]   ;;  %v3544_v28 = vld [vmem:[#allocation5 + $0x2c4] ss:$16 sps:$4 sm:$0xff]   ;;  %v3547_v29 = vld [vmem:[#allocation5 + $0x2cc] ss:$16 sps:$4 sm:$0xff]  }
  0x69   :  { %1313 = vmatprep.subr.bf16.mxu0 %v3458_v32  ;;  %1477 = vmatprep.subr.bf16.mxu1 %v3460_v33  ;;  %v84_v30 = vld [vmem:[#allocation2 + $0x18] sm:$0xff]  ;;  %v3545_v33 = vld [vmem:[#allocation5 + $0x2c8] ss:$16 sps:$4 sm:$0xff]   ;;  %s2946_s30 = sshll.u32 %s4055_s29, 4  ;;  %s2947_s30 = int_to_ptr.vmem [resolvable:$true] %s2946_s30 }
  0x6a   :  { %v3542_v31 = vld [vmem:[#allocation5 + $0x2c0] ss:$16 sps:$4 sm:$0xff]   ;;  %v91_v32 = vpack.c.bf16 %v84_v30, %v84_v30  ;;  %v3568_v46 = vld [vmem:[#allocation5 + $0x344] ss:$16 sps:$4 sm:$0xff]   ;;  %s4016_s8 = scalar_lea.vmem %s2947_s30, 64  ;;  %p4021_p5 = scmp.lt.s32.totalorder %s2947_s30, %s2947_s30 }
  0x6b   :  { %v3566_v48 = vld [vmem:[#allocation5 + $0x340] ss:$16 sps:$4 sm:$0xff]   ;;  %v3598_v2 = vld [vmem:[#allocation5 + $0x3e4] ss:$16 sps:$4 sm:$0xff]   ;;  %p4017_p4 = scmp.ne.s32.totalorder %s2947_s30, %s4016_s8  ;;  %p4022_p6 = scmp.lt.s32.totalorder %s4016_s8, %s4016_s8 }
  0x6c   :  { %1314 = vmatpush1.bf16.msra.mxu0 %v3462_v34  ;;  %1478 = vmatpush1.bf16.msra.mxu1 %v3463_v35  ;;  %v3550_v34 = vld [vmem:[#allocation5 + $0x2e4] ss:$16 sps:$4 sm:$0xff]   ;;  %v3553_v35 = vld [vmem:[#allocation5 + $0x2ec] ss:$16 sps:$4 sm:$0xff]  }
  0x6d   :  { %1315 = vmatprep.subr.bf16.mxu0 %v3464_v36  ;;  %1479 = vmatprep.subr.bf16.mxu1 %v3466_v37  ;;  %v3548_v36 = vld [vmem:[#allocation5 + $0x2e0] ss:$16 sps:$4 sm:$0xff]   ;;  %v3551_v37 = vld [vmem:[#allocation5 + $0x2e8] ss:$16 sps:$4 sm:$0xff]   ;;  %v3634_v30 = vld [vmem:[#allocation5 + $0x4a4] ss:$16 sps:$4 sm:$0xff]   ;;  %p4023_p7 = por %p4022_p6, %p4021_p5 }
  0x6f   :  { %p4024_p8 = pnand %p4023_p7, %p4017_p4 }
  0x70   :  { %1316 = vmatpush1.bf16.msra.mxu0 %v3468_v38  ;;  %1480 = vmatpush1.bf16.msra.mxu1 %v3469_v39  ;;  %v3556_v38 = vld [vmem:[#allocation5 + $0x304] ss:$16 sps:$4 sm:$0xff]   ;;  %v3559_v39 = vld [vmem:[#allocation5 + $0x30c] ss:$16 sps:$4 sm:$0xff]  }
  0x71   :  { %1317 = vmatprep.subr.bf16.mxu0 %v3470_v40  ;;  %1481 = vmatprep.subr.bf16.mxu1 %v3472_v41  ;;  %v3554_v40 = vld [vmem:[#allocation5 + $0x300] ss:$16 sps:$4 sm:$0xff]   ;;  %v3557_v41 = vld [vmem:[#allocation5 + $0x308] ss:$16 sps:$4 sm:$0xff]  }
  0x74   :  { %1318 = vmatpush1.bf16.msra.mxu0 %v3474_v42  ;;  %1482 = vmatpush1.bf16.msra.mxu1 %v3475_v43  ;;  %v3562_v42 = vld [vmem:[#allocation5 + $0x324] ss:$16 sps:$4 sm:$0xff]   ;;  %v3565_v43 = vld [vmem:[#allocation5 + $0x32c] ss:$16 sps:$4 sm:$0xff]  }
  0x75   :  { %1319 = vmatprep.subr.bf16.mxu0 %v3476_v44  ;;  %1483 = vmatprep.subr.bf16.mxu1 %v3478_v45  ;;  %v3560_v44 = vld [vmem:[#allocation5 + $0x320] ss:$16 sps:$4 sm:$0xff]   ;;  %v3563_v45 = vld [vmem:[#allocation5 + $0x328] ss:$16 sps:$4 sm:$0xff]  }
  0x78   :  { %1320 = vmatpush1.bf16.msra.mxu0 %v3480_v47  ;;  %1484 = vmatpush1.bf16.msra.mxu1 %v3481_v49  ;;  %v3571_v47 = vld [vmem:[#allocation5 + $0x34c] ss:$16 sps:$4 sm:$0xff]   ;;  %v3569_v49 = vld [vmem:[#allocation5 + $0x348] ss:$16 sps:$4 sm:$0xff]  }
  0x79   :  { %1321 = vmatprep.subr.bf16.mxu0 %v3482_v50  ;;  %1485 = vmatprep.subr.bf16.mxu1 %v3484_v51  ;;  %v3574_v50 = vld [vmem:[#allocation5 + $0x364] ss:$16 sps:$4 sm:$0xff]   ;;  %v3577_v51 = vld [vmem:[#allocation5 + $0x36c] ss:$16 sps:$4 sm:$0xff]  }
  0x7c   :  { %1322 = vmatpush1.bf16.msra.mxu0 %v3486_v52  ;;  %1486 = vmatpush1.bf16.msra.mxu1 %v3487_v53  ;;  %v3572_v52 = vld [vmem:[#allocation5 + $0x360] ss:$16 sps:$4 sm:$0xff]   ;;  %v3575_v53 = vld [vmem:[#allocation5 + $0x368] ss:$16 sps:$4 sm:$0xff]  }
  0x7d   :  { %1323 = vmatprep.subr.bf16.mxu0 %v3488_v54  ;;  %1487 = vmatprep.subr.bf16.mxu1 %v3490_v55  ;;  %v3580_v54 = vld [vmem:[#allocation5 + $0x384] ss:$16 sps:$4 sm:$0xff]   ;;  %v3583_v55 = vld [vmem:[#allocation5 + $0x38c] ss:$16 sps:$4 sm:$0xff]  }
  0x80   :  { %1324 = vmatpush1.bf16.msra.mxu0 %v3492_v56  ;;  %1488 = vmatpush1.bf16.msra.mxu1 %v3493_v57  ;;  %v3578_v56 = vld [vmem:[#allocation5 + $0x380] ss:$16 sps:$4 sm:$0xff]   ;;  %v3581_v57 = vld [vmem:[#allocation5 + $0x388] ss:$16 sps:$4 sm:$0xff]  }
  0x81   :  { %1325 = vmatprep.subr.bf16.mxu0 %v3494_v58  ;;  %1489 = vmatprep.subr.bf16.mxu1 %v3496_v59  ;;  %v3586_v58 = vld [vmem:[#allocation5 + $0x3a4] ss:$16 sps:$4 sm:$0xff]   ;;  %v3589_v59 = vld [vmem:[#allocation5 + $0x3ac] ss:$16 sps:$4 sm:$0xff]  }
  0x84   :  { %1326 = vmatpush1.bf16.msra.mxu0 %v3498_v60  ;;  %1490 = vmatpush1.bf16.msra.mxu1 %v3499_v61  ;;  %v3584_v60 = vld [vmem:[#allocation5 + $0x3a0] ss:$16 sps:$4 sm:$0xff]   ;;  %v3587_v61 = vld [vmem:[#allocation5 + $0x3a8] ss:$16 sps:$4 sm:$0xff]  }
  0x85   :  { %1327 = vmatprep.subr.bf16.mxu0 %v3500_v62  ;;  %1491 = vmatprep.subr.bf16.mxu1 %v3502_v63  ;;  %v3592_v62 = vld [vmem:[#allocation5 + $0x3c4] ss:$16 sps:$4 sm:$0xff]   ;;  %v3595_v63 = vld [vmem:[#allocation5 + $0x3cc] ss:$16 sps:$4 sm:$0xff]  }
  0x88   :  { %1328 = vmatpush1.bf16.msra.mxu0 %v3504_v0  ;;  %1492 = vmatpush1.bf16.msra.mxu1 %v3505_v1  ;;  %v3590_v0 = vld [vmem:[#allocation5 + $0x3c0] ss:$16 sps:$4 sm:$0xff]   ;;  %v3593_v1 = vld [vmem:[#allocation5 + $0x3c8] ss:$16 sps:$4 sm:$0xff]  }
  0x89   :  { %1338 = vmatprep.subr.bf16.mxu0 %v3508_v3  ;;  %1502 = vmatprep.subr.bf16.mxu1 %v3511_v4  ;;  %v3601_v3 = vld [vmem:[#allocation5 + $0x3ec] ss:$16 sps:$4 sm:$0xff]   ;;  %v3596_v4 = vld [vmem:[#allocation5 + $0x3e0] ss:$16 sps:$4 sm:$0xff]  }
  0x8b   :  { %1330 = vmatmul.mubr.bf16.vlgmr.msra.gmra.mrb[0].mxu0 %v88_v5  ;;  %1494 = vmatmul.mubr.bf16.vlgmr.msra.gmra.mrb[0].mxu1 %v88_v5  ;;  %v3599_v5 = vld [vmem:[#allocation5 + $0x3e8] ss:$16 sps:$4 sm:$0xff]  }
  0x8c   :  { %1339 = vmatpush1.bf16.msra.mxu0 %v3506_v6  ;;  %1503 = vmatpush1.bf16.msra.mxu1 %v3509_v7  ;;  %v3604_v6 = vld [vmem:[#allocation5 + $0x404] ss:$16 sps:$4 sm:$0xff]   ;;  %v83_v7 = vld [vmem:[#allocation2 + $0x10] sm:$0xff] }
  0x8d   :  { %1340 = vmatprep.subr.bf16.mxu0 %v3514_v8  ;;  %1504 = vmatprep.subr.bf16.mxu1 %v3517_v9  ;;  %v3607_v8 = vld [vmem:[#allocation5 + $0x40c] ss:$16 sps:$4 sm:$0xff]   ;;  %v3602_v9 = vld [vmem:[#allocation5 + $0x400] ss:$16 sps:$4 sm:$0xff]  }
  0x8e   :  { %1370 = vmatprep.mubr.bf16.mxu0 %v91_v32  ;;  %1534 = vmatprep.mubr.bf16.mxu1 %v91_v32  ;;  %v3632_v32 = vld [vmem:[#allocation5 + $0x4a0] ss:$16 sps:$4 sm:$0xff]  }
  0x90   :  { %1341 = vmatpush1.bf16.msra.mxu0 %v3512_v10  ;;  %1505 = vmatpush1.bf16.msra.mxu1 %v3515_v11  ;;  %v90_v10 = vpack.c.bf16 %v83_v7, %v83_v7  ;;  %v3605_v11 = vld [vmem:[#allocation5 + $0x408] ss:$16 sps:$4 sm:$0xff]   ;;  %v3697_v7 = vld [vmem:[#allocation5 + $0x5ec] ss:$16 sps:$4 sm:$0xff]  }
  0x91   :  { %1342 = vmatprep.subr.bf16.mxu0 %v3520_v12  ;;  %1506 = vmatprep.subr.bf16.mxu1 %v3523_v13  ;;  %v3610_v12 = vld [vmem:[#allocation5 + $0x424] ss:$16 sps:$4 sm:$0xff]   ;;  %v3613_v13 = vld [vmem:[#allocation5 + $0x42c] ss:$16 sps:$4 sm:$0xff]  }
  0x94   :  { %1343 = vmatpush1.bf16.msra.mxu0 %v3518_v14  ;;  %1507 = vmatpush1.bf16.msra.mxu1 %v3521_v15  ;;  %v86_v14 = vld [vmem:[#allocation2 + $0x28] sm:$0xff] }
  0x95   :  { %1344 = vmatprep.subr.bf16.mxu0 %v3526_v16  ;;  %1508 = vmatprep.subr.bf16.mxu1 %v3529_v17  ;;  %v93_v15 = vpack.c.bf16 %v86_v14, %v86_v14  ;;  %v3608_v16 = vld [vmem:[#allocation5 + $0x420] ss:$16 sps:$4 sm:$0xff]   ;;  %v3611_v17 = vld [vmem:[#allocation5 + $0x428] ss:$16 sps:$4 sm:$0xff]  }
  0x96   :  { %v3701_v14 = vld [vmem:[#allocation5 + $0x608] ss:$16 sps:$4 sm:$0xff]  }
  0x98   :  { %1345 = vmatpush1.bf16.msra.mxu0 %v3524_v18  ;;  %1509 = vmatpush1.bf16.msra.mxu1 %v3527_v19  ;;  %v3616_v18 = vld [vmem:[#allocation5 + $0x444] ss:$16 sps:$4 sm:$0xff]   ;;  %v3619_v19 = vld [vmem:[#allocation5 + $0x44c] ss:$16 sps:$4 sm:$0xff]  }
  0x99   :  { %1346 = vmatprep.subr.bf16.mxu0 %v3532_v20  ;;  %1510 = vmatprep.subr.bf16.mxu1 %v3535_v21  ;;  %v3614_v20 = vld [vmem:[#allocation5 + $0x440] ss:$16 sps:$4 sm:$0xff]   ;;  %v3617_v21 = vld [vmem:[#allocation5 + $0x448] ss:$16 sps:$4 sm:$0xff]  }
  0x9c   :  { %1347 = vmatpush1.bf16.msra.mxu0 %v3530_v22  ;;  %1511 = vmatpush1.bf16.msra.mxu1 %v3533_v23  ;;  %v3622_v22 = vld [vmem:[#allocation5 + $0x464] ss:$16 sps:$4 sm:$0xff]   ;;  %v3625_v23 = vld [vmem:[#allocation5 + $0x46c] ss:$16 sps:$4 sm:$0xff]  }
  0x9d   :  { %1348 = vmatprep.subr.bf16.mxu0 %v3538_v24  ;;  %1512 = vmatprep.subr.bf16.mxu1 %v3541_v25  ;;  %v3620_v24 = vld [vmem:[#allocation5 + $0x460] ss:$16 sps:$4 sm:$0xff]   ;;  %v3623_v25 = vld [vmem:[#allocation5 + $0x468] ss:$16 sps:$4 sm:$0xff]  }
  0xa0   :  { %1349 = vmatpush1.bf16.msra.mxu0 %v3536_v26  ;;  %1513 = vmatpush1.bf16.msra.mxu1 %v3539_v27  ;;  %v3628_v26 = vld [vmem:[#allocation5 + $0x484] ss:$16 sps:$4 sm:$0xff]   ;;  %v3631_v27 = vld [vmem:[#allocation5 + $0x48c] ss:$16 sps:$4 sm:$0xff]  }
  0xa1   :  { %1350 = vmatprep.subr.bf16.mxu0 %v3544_v28  ;;  %1514 = vmatprep.subr.bf16.mxu1 %v3547_v29  ;;  %v3626_v28 = vld [vmem:[#allocation5 + $0x480] ss:$16 sps:$4 sm:$0xff]   ;;  %v3629_v29 = vld [vmem:[#allocation5 + $0x488] ss:$16 sps:$4 sm:$0xff]  }
  0xa4   :  { %1351 = vmatpush1.bf16.msra.mxu0 %v3542_v31  ;;  %1515 = vmatpush1.bf16.msra.mxu1 %v3545_v33  ;;  %v3637_v31 = vld [vmem:[#allocation5 + $0x4ac] ss:$16 sps:$4 sm:$0xff]   ;;  %v3635_v33 = vld [vmem:[#allocation5 + $0x4a8] ss:$16 sps:$4 sm:$0xff]  }
  0xa5   :  { %1352 = vmatprep.subr.bf16.mxu0 %v3550_v34  ;;  %1516 = vmatprep.subr.bf16.mxu1 %v3553_v35  ;;  %v3640_v34 = vld [vmem:[#allocation5 + $0x4c4] ss:$16 sps:$4 sm:$0xff]   ;;  %v3643_v35 = vld [vmem:[#allocation5 + $0x4cc] ss:$16 sps:$4 sm:$0xff]  }
  0xa8   :  { %1353 = vmatpush1.bf16.msra.mxu0 %v3548_v36  ;;  %1517 = vmatpush1.bf16.msra.mxu1 %v3551_v37  ;;  %v3638_v36 = vld [vmem:[#allocation5 + $0x4c0] ss:$16 sps:$4 sm:$0xff]   ;;  %v3641_v37 = vld [vmem:[#allocation5 + $0x4c8] ss:$16 sps:$4 sm:$0xff]  }
  0xa9   :  { %1354 = vmatprep.subr.bf16.mxu0 %v3556_v38  ;;  %1518 = vmatprep.subr.bf16.mxu1 %v3559_v39  ;;  %v3646_v38 = vld [vmem:[#allocation5 + $0x4e4] ss:$16 sps:$4 sm:$0xff]   ;;  %v3649_v39 = vld [vmem:[#allocation5 + $0x4ec] ss:$16 sps:$4 sm:$0xff]  }
  0xac   :  { %1355 = vmatpush1.bf16.msra.mxu0 %v3554_v40  ;;  %1519 = vmatpush1.bf16.msra.mxu1 %v3557_v41  ;;  %v3644_v40 = vld [vmem:[#allocation5 + $0x4e0] ss:$16 sps:$4 sm:$0xff]   ;;  %v3647_v41 = vld [vmem:[#allocation5 + $0x4e8] ss:$16 sps:$4 sm:$0xff]  }
  0xad   :  { %1356 = vmatprep.subr.bf16.mxu0 %v3562_v42  ;;  %1520 = vmatprep.subr.bf16.mxu1 %v3565_v43  ;;  %v3652_v42 = vld [vmem:[#allocation5 + $0x504] ss:$16 sps:$4 sm:$0xff]   ;;  %v3655_v43 = vld [vmem:[#allocation5 + $0x50c] ss:$16 sps:$4 sm:$0xff]  }
  0xb0   :  { %1357 = vmatpush1.bf16.msra.mxu0 %v3560_v44  ;;  %1521 = vmatpush1.bf16.msra.mxu1 %v3563_v45  ;;  %v3650_v44 = vld [vmem:[#allocation5 + $0x500] ss:$16 sps:$4 sm:$0xff]   ;;  %v3653_v45 = vld [vmem:[#allocation5 + $0x508] ss:$16 sps:$4 sm:$0xff]  }
  0xb1   :  { %1358 = vmatprep.subr.bf16.mxu0 %v3568_v46  ;;  %1522 = vmatprep.subr.bf16.mxu1 %v3571_v47  ;;  %v3658_v46 = vld [vmem:[#allocation5 + $0x524] ss:$16 sps:$4 sm:$0xff]   ;;  %v3661_v47 = vld [vmem:[#allocation5 + $0x52c] ss:$16 sps:$4 sm:$0xff]  }
  0xb4   :  { %1359 = vmatpush1.bf16.msra.mxu0 %v3566_v48  ;;  %1523 = vmatpush1.bf16.msra.mxu1 %v3569_v49  ;;  %v3656_v48 = vld [vmem:[#allocation5 + $0x520] ss:$16 sps:$4 sm:$0xff]   ;;  %v3659_v49 = vld [vmem:[#allocation5 + $0x528] ss:$16 sps:$4 sm:$0xff]  }
  0xb5   :  { %1360 = vmatprep.subr.bf16.mxu0 %v3574_v50  ;;  %1524 = vmatprep.subr.bf16.mxu1 %v3577_v51  ;;  %v3664_v50 = vld [vmem:[#allocation5 + $0x544] ss:$16 sps:$4 sm:$0xff]   ;;  %v3667_v51 = vld [vmem:[#allocation5 + $0x54c] ss:$16 sps:$4 sm:$0xff]  }
  0xb8   :  { %1361 = vmatpush1.bf16.msra.mxu0 %v3572_v52  ;;  %1525 = vmatpush1.bf16.msra.mxu1 %v3575_v53  ;;  %v3662_v52 = vld [vmem:[#allocation5 + $0x540] ss:$16 sps:$4 sm:$0xff]   ;;  %v3665_v53 = vld [vmem:[#allocation5 + $0x548] ss:$16 sps:$4 sm:$0xff]  }
  0xb9   :  { %1362 = vmatprep.subr.bf16.mxu0 %v3580_v54  ;;  %1526 = vmatprep.subr.bf16.mxu1 %v3583_v55  ;;  %v3670_v54 = vld [vmem:[#allocation5 + $0x564] ss:$16 sps:$4 sm:$0xff]   ;;  %v3673_v55 = vld [vmem:[#allocation5 + $0x56c] ss:$16 sps:$4 sm:$0xff]  }
  0xbc   :  { %1363 = vmatpush1.bf16.msra.mxu0 %v3578_v56  ;;  %1527 = vmatpush1.bf16.msra.mxu1 %v3581_v57  ;;  %v3668_v56 = vld [vmem:[#allocation5 + $0x560] ss:$16 sps:$4 sm:$0xff]   ;;  %v3671_v57 = vld [vmem:[#allocation5 + $0x568] ss:$16 sps:$4 sm:$0xff]  }
  0xbd   :  { %1364 = vmatprep.subr.bf16.mxu0 %v3586_v58  ;;  %1528 = vmatprep.subr.bf16.mxu1 %v3589_v59  ;;  %v3676_v58 = vld [vmem:[#allocation5 + $0x584] ss:$16 sps:$4 sm:$0xff]   ;;  %v3679_v59 = vld [vmem:[#allocation5 + $0x58c] ss:$16 sps:$4 sm:$0xff]  }
  0xc0   :  { %1365 = vmatpush1.bf16.msra.mxu0 %v3584_v60  ;;  %1529 = vmatpush1.bf16.msra.mxu1 %v3587_v61  ;;  %v3674_v60 = vld [vmem:[#allocation5 + $0x580] ss:$16 sps:$4 sm:$0xff]   ;;  %v3677_v61 = vld [vmem:[#allocation5 + $0x588] ss:$16 sps:$4 sm:$0xff]  }
  0xc1   :  { %1366 = vmatprep.subr.bf16.mxu0 %v3592_v62  ;;  %1530 = vmatprep.subr.bf16.mxu1 %v3595_v63  ;;  %v3682_v62 = vld [vmem:[#allocation5 + $0x5a4] ss:$16 sps:$4 sm:$0xff]   ;;  %v3685_v63 = vld [vmem:[#allocation5 + $0x5ac] ss:$16 sps:$4 sm:$0xff]  }
  0xc4   :  { %1367 = vmatpush1.bf16.msra.mxu0 %v3590_v0  ;;  %1531 = vmatpush1.bf16.msra.mxu1 %v3593_v1  ;;  %v3680_v0 = vld [vmem:[#allocation5 + $0x5a0] ss:$16 sps:$4 sm:$0xff]   ;;  %v3683_v1 = vld [vmem:[#allocation5 + $0x5a8] ss:$16 sps:$4 sm:$0xff]  }
  0xc5   :  { %1368 = vmatprep.subr.bf16.mxu0 %v3598_v2  ;;  %1532 = vmatprep.subr.bf16.mxu1 %v3601_v3  ;;  %v3688_v2 = vld [vmem:[#allocation5 + $0x5c4] ss:$16 sps:$4 sm:$0xff]   ;;  %v3691_v3 = vld [vmem:[#allocation5 + $0x5cc] ss:$16 sps:$4 sm:$0xff]  }
  0xc8   :  { %1369 = vmatpush1.bf16.msra.mxu0 %v3596_v4  ;;  %1533 = vmatpush1.bf16.msra.mxu1 %v3599_v5  ;;  %v3686_v4 = vld [vmem:[#allocation5 + $0x5c0] ss:$16 sps:$4 sm:$0xff]   ;;  %v3689_v5 = vld [vmem:[#allocation5 + $0x5c8] ss:$16 sps:$4 sm:$0xff]  }
  0xc9   :  { %1379 = vmatprep.subr.bf16.mxu0 %v3604_v6  ;;  %1543 = vmatprep.subr.bf16.mxu1 %v3607_v8  ;;  %v3694_v6 = vld [vmem:[#allocation5 + $0x5e4] ss:$16 sps:$4 sm:$0xff]   ;;  %v3692_v8 = vld [vmem:[#allocation5 + $0x5e0] ss:$16 sps:$4 sm:$0xff]  }
  0xcb   :  { %1371 = vmatmul.mubr.bf16.vlgmr.msra.gmra.mrb[0].mxu0 %v90_v10  ;;  %1535 = vmatmul.mubr.bf16.vlgmr.msra.gmra.mrb[0].mxu1 %v90_v10  ;;  %v85_v10 = vld [vmem:[#allocation2 + $0x20] sm:$0xff] }
  0xcc   :  { %1380 = vmatpush1.bf16.msra.mxu0 %v3602_v9  ;;  %1544 = vmatpush1.bf16.msra.mxu1 %v3605_v11  ;;  %v3695_v9 = vld [vmem:[#allocation5 + $0x5e8] ss:$16 sps:$4 sm:$0xff]   ;;  %v3700_v11 = vld [vmem:[#allocation5 + $0x604] ss:$16 sps:$4 sm:$0xff]  }
  0xcd   :  { %1381 = vmatprep.subr.bf16.mxu0 %v3610_v12  ;;  %1545 = vmatprep.subr.bf16.mxu1 %v3613_v13  ;;  %v3703_v12 = vld [vmem:[#allocation5 + $0x60c] ss:$16 sps:$4 sm:$0xff]   ;;  %v3698_v13 = vld [vmem:[#allocation5 + $0x600] ss:$16 sps:$4 sm:$0xff]  }
  0xce   :  { %1411 = vmatprep.mubr.bf16.mxu0 %v93_v15  ;;  %1575 = vmatprep.mubr.bf16.mxu1 %v93_v15  ;;  %v92_v15 = vpack.c.bf16 %v85_v10, %v85_v10  ;;  %v3785_v10 = vld [vmem:[#allocation7 + $0x1a8] ss:$16 sps:$4 sm:$0xff]  }
  0xd0   :  { %1382 = vmatpush1.bf16.msra.mxu0 %v3608_v16  ;;  %1546 = vmatpush1.bf16.msra.mxu1 %v3611_v17  ;;  %v3706_v16 = vld [vmem:[#allocation7 + $0x4] ss:$16 sps:$4 sm:$0xff]   ;;  %v3709_v17 = vld [vmem:[#allocation7 + $0xc] ss:$16 sps:$4 sm:$0xff]  }
  0xd1   :  { %1383 = vmatprep.subr.bf16.mxu0 %v3616_v18  ;;  %1547 = vmatprep.subr.bf16.mxu1 %v3619_v19  ;;  %v4054_v18 = vmov 0   ;;  %v87_v19 = vld [vmem:[#allocation2 + $0x30] sm:$0xff] }
  0xd4   :  { %1384 = vmatpush1.bf16.msra.mxu0 %v3614_v20  ;;  %1548 = vmatpush1.bf16.msra.mxu1 %v3617_v21  ;;  %v3704_v20 = vld [vmem:[#allocation7] ss:$16 sps:$4 sm:$0xff]   ;;  %v3707_v21 = vld [vmem:[#allocation7 + $0x8] ss:$16 sps:$4 sm:$0xff]  }
  0xd5   :  { %1385 = vmatprep.subr.bf16.mxu0 %v3622_v22  ;;  %1549 = vmatprep.subr.bf16.mxu1 %v3625_v23  ;;  %v94_v22 = vpack.c.bf16 %v87_v19, %v87_v19  ;;  %v3712_v23 = vld [vmem:[#allocation7 + $0x24] ss:$16 sps:$4 sm:$0xff]  }
  0xd6   :  { %v3802_v19 = vld [vmem:[#allocation7 + $0x204] ss:$16 sps:$4 sm:$0xff]  }
  0xd8   :  { %1386 = vmatpush1.bf16.msra.mxu0 %v3620_v24  ;;  %1550 = vmatpush1.bf16.msra.mxu1 %v3623_v25  ;;  %v3715_v24 = vld [vmem:[#allocation7 + $0x2c] ss:$16 sps:$4 sm:$0xff]   ;;  %v3710_v25 = vld [vmem:[#allocation7 + $0x20] ss:$16 sps:$4 sm:$0xff]  }
  0xd9   :  { %1387 = vmatprep.subr.bf16.mxu0 %v3628_v26  ;;  %1551 = vmatprep.subr.bf16.mxu1 %v3631_v27  ;;  %v3713_v26 = vld [vmem:[#allocation7 + $0x28] ss:$16 sps:$4 sm:$0xff]   ;;  %v3718_v27 = vld [vmem:[#allocation7 + $0x44] ss:$16 sps:$4 sm:$0xff]  }
  0xdc   :  { %1388 = vmatpush1.bf16.msra.mxu0 %v3626_v28  ;;  %1552 = vmatpush1.bf16.msra.mxu1 %v3629_v29  ;;  %v3721_v28 = vld [vmem:[#allocation7 + $0x4c] ss:$16 sps:$4 sm:$0xff]   ;;  %v3716_v29 = vld [vmem:[#allocation7 + $0x40] ss:$16 sps:$4 sm:$0xff]  }
  0xdd   :  { %1389 = vmatprep.subr.bf16.mxu0 %v3634_v30  ;;  %1553 = vmatprep.subr.bf16.mxu1 %v3637_v31  ;;  %v3719_v30 = vld [vmem:[#allocation7 + $0x48] ss:$16 sps:$4 sm:$0xff]   ;;  %v3724_v31 = vld [vmem:[#allocation7 + $0x64] ss:$16 sps:$4 sm:$0xff]  }
  0xe0   :  { %1390 = vmatpush1.bf16.msra.mxu0 %v3632_v32  ;;  %1554 = vmatpush1.bf16.msra.mxu1 %v3635_v33  ;;  %v3727_v32 = vld [vmem:[#allocation7 + $0x6c] ss:$16 sps:$4 sm:$0xff]   ;;  %v3722_v33 = vld [vmem:[#allocation7 + $0x60] ss:$16 sps:$4 sm:$0xff]  }
  0xe1   :  { %1391 = vmatprep.subr.bf16.mxu0 %v3640_v34  ;;  %1555 = vmatprep.subr.bf16.mxu1 %v3643_v35  ;;  %v3725_v34 = vld [vmem:[#allocation7 + $0x68] ss:$16 sps:$4 sm:$0xff]   ;;  %v3730_v35 = vld [vmem:[#allocation7 + $0x84] ss:$16 sps:$4 sm:$0xff]  }
  0xe4   :  { %1392 = vmatpush1.bf16.msra.mxu0 %v3638_v36  ;;  %1556 = vmatpush1.bf16.msra.mxu1 %v3641_v37  ;;  %v3733_v36 = vld [vmem:[#allocation7 + $0x8c] ss:$16 sps:$4 sm:$0xff]   ;;  %v3728_v37 = vld [vmem:[#allocation7 + $0x80] ss:$16 sps:$4 sm:$0xff]  }
  0xe5   :  { %1393 = vmatprep.subr.bf16.mxu0 %v3646_v38  ;;  %1557 = vmatprep.subr.bf16.mxu1 %v3649_v39  ;;  %v3731_v38 = vld [vmem:[#allocation7 + $0x88] ss:$16 sps:$4 sm:$0xff]   ;;  %v3736_v39 = vld [vmem:[#allocation7 + $0xa4] ss:$16 sps:$4 sm:$0xff]  }
  0xe8   :  { %1394 = vmatpush1.bf16.msra.mxu0 %v3644_v40  ;;  %1558 = vmatpush1.bf16.msra.mxu1 %v3647_v41  ;;  %v3739_v40 = vld [vmem:[#allocation7 + $0xac] ss:$16 sps:$4 sm:$0xff]   ;;  %v3734_v41 = vld [vmem:[#allocation7 + $0xa0] ss:$16 sps:$4 sm:$0xff]  }
  0xe9   :  { %1395 = vmatprep.subr.bf16.mxu0 %v3652_v42  ;;  %1559 = vmatprep.subr.bf16.mxu1 %v3655_v43  ;;  %v3737_v42 = vld [vmem:[#allocation7 + $0xa8] ss:$16 sps:$4 sm:$0xff]   ;;  %v3742_v43 = vld [vmem:[#allocation7 + $0xc4] ss:$16 sps:$4 sm:$0xff]  }
  0xec   :  { %1396 = vmatpush1.bf16.msra.mxu0 %v3650_v44  ;;  %1560 = vmatpush1.bf16.msra.mxu1 %v3653_v45  ;;  %v3745_v44 = vld [vmem:[#allocation7 + $0xcc] ss:$16 sps:$4 sm:$0xff]   ;;  %v3740_v45 = vld [vmem:[#allocation7 + $0xc0] ss:$16 sps:$4 sm:$0xff]  }
  0xed   :  { %1397 = vmatprep.subr.bf16.mxu0 %v3658_v46  ;;  %1561 = vmatprep.subr.bf16.mxu1 %v3661_v47  ;;  %v3743_v46 = vld [vmem:[#allocation7 + $0xc8] ss:$16 sps:$4 sm:$0xff]   ;;  %v3748_v47 = vld [vmem:[#allocation7 + $0xe4] ss:$16 sps:$4 sm:$0xff]  }
  0xf0   :  { %1398 = vmatpush1.bf16.msra.mxu0 %v3656_v48  ;;  %1562 = vmatpush1.bf16.msra.mxu1 %v3659_v49  ;;  %v3751_v48 = vld [vmem:[#allocation7 + $0xec] ss:$16 sps:$4 sm:$0xff]   ;;  %v3746_v49 = vld [vmem:[#allocation7 + $0xe0] ss:$16 sps:$4 sm:$0xff]  }
  0xf1   :  { %1399 = vmatprep.subr.bf16.mxu0 %v3664_v50  ;;  %1563 = vmatprep.subr.bf16.mxu1 %v3667_v51  ;;  %v3749_v50 = vld [vmem:[#allocation7 + $0xe8] ss:$16 sps:$4 sm:$0xff]   ;;  %v3754_v51 = vld [vmem:[#allocation7 + $0x104] ss:$16 sps:$4 sm:$0xff]  }
  0xf4   :  { %1400 = vmatpush1.bf16.msra.mxu0 %v3662_v52  ;;  %1564 = vmatpush1.bf16.msra.mxu1 %v3665_v53  ;;  %v3757_v52 = vld [vmem:[#allocation7 + $0x10c] ss:$16 sps:$4 sm:$0xff]   ;;  %v3752_v53 = vld [vmem:[#allocation7 + $0x100] ss:$16 sps:$4 sm:$0xff]  }
  0xf5   :  { %1401 = vmatprep.subr.bf16.mxu0 %v3670_v54  ;;  %1565 = vmatprep.subr.bf16.mxu1 %v3673_v55  ;;  %v3755_v54 = vld [vmem:[#allocation7 + $0x108] ss:$16 sps:$4 sm:$0xff]   ;;  %v3760_v55 = vld [vmem:[#allocation7 + $0x124] ss:$16 sps:$4 sm:$0xff]  }
  0xf8   :  { %1402 = vmatpush1.bf16.msra.mxu0 %v3668_v56  ;;  %1566 = vmatpush1.bf16.msra.mxu1 %v3671_v57  ;;  %v3763_v56 = vld [vmem:[#allocation7 + $0x12c] ss:$16 sps:$4 sm:$0xff]   ;;  %v3758_v57 = vld [vmem:[#allocation7 + $0x120] ss:$16 sps:$4 sm:$0xff]  }
  0xf9   :  { %1403 = vmatprep.subr.bf16.mxu0 %v3676_v58  ;;  %1567 = vmatprep.subr.bf16.mxu1 %v3679_v59  ;;  %v3761_v58 = vld [vmem:[#allocation7 + $0x128] ss:$16 sps:$4 sm:$0xff]   ;;  %v3766_v59 = vld [vmem:[#allocation7 + $0x144] ss:$16 sps:$4 sm:$0xff]  }
  0xfc   :  { %1404 = vmatpush1.bf16.msra.mxu0 %v3674_v60  ;;  %1568 = vmatpush1.bf16.msra.mxu1 %v3677_v61  ;;  %v3769_v60 = vld [vmem:[#allocation7 + $0x14c] ss:$16 sps:$4 sm:$0xff]   ;;  %v3764_v61 = vld [vmem:[#allocation7 + $0x140] ss:$16 sps:$4 sm:$0xff]  }
  0xfd   :  { %1405 = vmatprep.subr.bf16.mxu0 %v3682_v62  ;;  %1569 = vmatprep.subr.bf16.mxu1 %v3685_v63  ;;  %v3767_v62 = vld [vmem:[#allocation7 + $0x148] ss:$16 sps:$4 sm:$0xff]   ;;  %v3772_v63 = vld [vmem:[#allocation7 + $0x164] ss:$16 sps:$4 sm:$0xff]  }
 0x100   :  { %1406 = vmatpush1.bf16.msra.mxu0 %v3680_v0  ;;  %1570 = vmatpush1.bf16.msra.mxu1 %v3683_v1  ;;  %v3775_v0 = vld [vmem:[#allocation7 + $0x16c] ss:$16 sps:$4 sm:$0xff]   ;;  %v3770_v1 = vld [vmem:[#allocation7 + $0x160] ss:$16 sps:$4 sm:$0xff]  }
 0x101   :  { %1407 = vmatprep.subr.bf16.mxu0 %v3688_v2  ;;  %1571 = vmatprep.subr.bf16.mxu1 %v3691_v3  ;;  %v3773_v2 = vld [vmem:[#allocation7 + $0x168] ss:$16 sps:$4 sm:$0xff]   ;;  %v3778_v3 = vld [vmem:[#allocation7 + $0x184] ss:$16 sps:$4 sm:$0xff]  }
 0x104   :  { %1408 = vmatpush1.bf16.msra.mxu0 %v3686_v4  ;;  %1572 = vmatpush1.bf16.msra.mxu1 %v3689_v5  ;;  %v3781_v4 = vld [vmem:[#allocation7 + $0x18c] ss:$16 sps:$4 sm:$0xff]   ;;  %v3776_v5 = vld [vmem:[#allocation7 + $0x180] ss:$16 sps:$4 sm:$0xff]  }
 0x105   :  { %1409 = vmatprep.subr.bf16.mxu0 %v3694_v6  ;;  %1573 = vmatprep.subr.bf16.mxu1 %v3697_v7  ;;  %v3779_v6 = vld [vmem:[#allocation7 + $0x188] ss:$16 sps:$4 sm:$0xff]   ;;  %v3784_v7 = vld [vmem:[#allocation7 + $0x1a4] ss:$16 sps:$4 sm:$0xff]  }
 0x108   :  { %1410 = vmatpush1.bf16.msra.mxu0 %v3692_v8  ;;  %1574 = vmatpush1.bf16.msra.mxu1 %v3695_v9  ;;  %v3787_v8 = vld [vmem:[#allocation7 + $0x1ac] ss:$16 sps:$4 sm:$0xff]   ;;  %v3782_v9 = vld [vmem:[#allocation7 + $0x1a0] ss:$16 sps:$4 sm:$0xff]  }
 0x109   :  { %1420 = vmatprep.subr.bf16.mxu0 %v3700_v11  ;;  %1584 = vmatprep.subr.bf16.mxu1 %v3703_v12  ;;  %v3790_v11 = vld [vmem:[#allocation7 + $0x1c4] ss:$16 sps:$4 sm:$0xff]   ;;  %v3793_v12 = vld [vmem:[#allocation7 + $0x1cc] ss:$16 sps:$4 sm:$0xff]  }
 0x10b   :  { %1412 = vmatmul.mubr.bf16.vlgmr.msra.gmra.mrb[0].mxu0 %v92_v15  ;;  %1576 = vmatmul.mubr.bf16.vlgmr.msra.gmra.mrb[0].mxu1 %v92_v15  ;;  %v3796_v15 = vld [vmem:[#allocation7 + $0x1e4] ss:$16 sps:$4 sm:$0xff]  }
 0x10c   :  { %1421 = vmatpush1.bf16.msra.mxu0 %v3698_v13  ;;  %1585 = vmatpush1.bf16.msra.mxu1 %v3701_v14  ;;  %v3788_v13 = vld [vmem:[#allocation7 + $0x1c0] ss:$16 sps:$4 sm:$0xff]   ;;  %v3791_v14 = vld [vmem:[#allocation7 + $0x1c8] ss:$16 sps:$4 sm:$0xff]  }
 0x10d   :  { %1452 = vmatprep.mubr.bf16.mxu0 %v4054_v18  ;;  %1616 = vmatprep.mubr.bf16.mxu1 %v4054_v18  ;;  %v3797_v18 = vld [vmem:[#allocation7 + $0x1e8] ss:$16 sps:$4 sm:$0xff]  }
 0x10e   :  { %2423 = vmatprep.subr.bf16.mxu0 %v3706_v16  ;;  %2505 = vmatprep.subr.bf16.mxu1 %v3709_v17  ;;  %v3799_v16 = vld [vmem:[#allocation7 + $0x1ec] ss:$16 sps:$4 sm:$0xff]   ;;  %v3794_v17 = vld [vmem:[#allocation7 + $0x1e0] ss:$16 sps:$4 sm:$0xff]  }
 0x117   :  { %3153 = vmatmul.mubr.msk.bf16.vlgmr.msra.gmra.mrb[0].mxu0 %vm1293_vm0, %v94_v22  ;;  %3154 = vmatmul.mubr.msk.bf16.vlgmr.msra.gmra.mrb[0].mxu1 %vm1293_vm0, %v94_v22 }
 0x118   :  { %2424 = vmatpush1.bf16.msra.mxu0 %v3704_v20  ;;  %2506 = vmatpush1.bf16.msra.mxu1 %v3707_v21  ;;  %v3805_v20 = vld [vmem:[#allocation7 + $0x20c] ss:$16 sps:$4 sm:$0xff]   ;;  %v293_v21 = vlaneseq }
 0x119   :  { %2425 = vmatprep.subr.bf16.mxu0 %v3712_v23  ;;  %2507 = vmatprep.subr.bf16.mxu1 %v3715_v24  ;;  %v4156_v24 = vld [vmem:[%s4204_s2] sm:$0xf] }
 0x11a   :  { %v4150_v22 = vshrl.u32 %v293_v21, 7  ;;  %v3862_v21 = vld [vmem:[#allocation7 + $0x344] ss:$16 sps:$4 sm:$0xff]  }
 0x11c   :  { %2426 = vmatpush1.bf16.msra.mxu0 %v3710_v25  ;;  %2508 = vmatpush1.bf16.msra.mxu1 %v3713_v26  ;;  %v295_v23 = vsub.s32 0, %v4150_v22  ;;  %v299_v25 = vsub.s32 1, %v4150_v22  ;;  %v307_v26 = vsub.s32 3, %v4150_v22 }
 0x11d   :  { %2427 = vmatprep.subr.bf16.mxu0 %v3718_v27  ;;  %2509 = vmatprep.subr.bf16.mxu1 %v3721_v28 }
 0x11e   :  { %v296_v27 = vrot.slane %v4156_v24, %v295_v23  ;;  %v300_v28 = vrot.slane %v4156_v24, %v299_v25 }
 0x120   :  { %2428 = vmatpush1.bf16.msra.mxu0 %v3716_v29  ;;  %2510 = vmatpush1.bf16.msra.mxu1 %v3719_v30  ;;  %v308_v29 = vrot.slane %v4156_v24, %v307_v26 }
 0x121   :  { %2429 = vmatprep.subr.bf16.mxu0 %v3724_v31  ;;  %2511 = vmatprep.subr.bf16.mxu1 %v3727_v32 }
 0x124   :  { %2430 = vmatpush1.bf16.msra.mxu0 %v3722_v33  ;;  %2512 = vmatpush1.bf16.msra.mxu1 %v3725_v34 }
 0x125   :  { %2431 = vmatprep.subr.bf16.mxu0 %v3730_v35  ;;  %2513 = vmatprep.subr.bf16.mxu1 %v3733_v36 }
 0x128   :  { %2432 = vmatpush1.bf16.msra.mxu0 %v3728_v37  ;;  %2514 = vmatpush1.bf16.msra.mxu1 %v3731_v38 }
 0x129   :  { %2433 = vmatprep.subr.bf16.mxu0 %v3736_v39  ;;  %2515 = vmatprep.subr.bf16.mxu1 %v3739_v40 }
 0x12c   :  { %2434 = vmatpush1.bf16.msra.mxu0 %v3734_v41  ;;  %2516 = vmatpush1.bf16.msra.mxu1 %v3737_v42 }
 0x12d   :  { %2435 = vmatprep.subr.bf16.mxu0 %v3742_v43  ;;  %2517 = vmatprep.subr.bf16.mxu1 %v3745_v44 }
 0x130   :  { %2436 = vmatpush1.bf16.msra.mxu0 %v3740_v45  ;;  %2518 = vmatpush1.bf16.msra.mxu1 %v3743_v46  ;;  %v3800_v45 = vld [vmem:[#allocation7 + $0x200] ss:$16 sps:$4 sm:$0xff]   ;;  %v3803_v46 = vld [vmem:[#allocation7 + $0x208] ss:$16 sps:$4 sm:$0xff]  }
 0x131   :  { %2437 = vmatprep.subr.bf16.mxu0 %v3748_v47  ;;  %2519 = vmatprep.subr.bf16.mxu1 %v3751_v48  ;;  %v3808_v48 = vld [vmem:[#allocation7 + $0x224] ss:$16 sps:$4 sm:$0xff]  }
 0x134   :  { %2438 = vmatpush1.bf16.msra.mxu0 %v3746_v49  ;;  %2520 = vmatpush1.bf16.msra.mxu1 %v3749_v50  ;;  %v3811_v49 = vld [vmem:[#allocation7 + $0x22c] ss:$16 sps:$4 sm:$0xff]  }
 0x135   :  { %2439 = vmatprep.subr.bf16.mxu0 %v3754_v51  ;;  %2521 = vmatprep.subr.bf16.mxu1 %v3757_v52  ;;  %v3806_v51 = vld [vmem:[#allocation7 + $0x220] ss:$16 sps:$4 sm:$0xff]   ;;  %v3809_v52 = vld [vmem:[#allocation7 + $0x228] ss:$16 sps:$4 sm:$0xff]  }
 0x138   :  { %2440 = vmatpush1.bf16.msra.mxu0 %v3752_v53  ;;  %2522 = vmatpush1.bf16.msra.mxu1 %v3755_v54  ;;  %v3814_v53 = vld [vmem:[#allocation7 + $0x244] ss:$16 sps:$4 sm:$0xff]   ;;  %v3817_v54 = vld [vmem:[#allocation7 + $0x24c] ss:$16 sps:$4 sm:$0xff]  }
 0x139   :  { %2441 = vmatprep.subr.bf16.mxu0 %v3760_v55  ;;  %2523 = vmatprep.subr.bf16.mxu1 %v3763_v56  ;;  %v3812_v55 = vld [vmem:[#allocation7 + $0x240] ss:$16 sps:$4 sm:$0xff]   ;;  %v3815_v56 = vld [vmem:[#allocation7 + $0x248] ss:$16 sps:$4 sm:$0xff]  }
 0x13c   :  { %2442 = vmatpush1.bf16.msra.mxu0 %v3758_v57  ;;  %2524 = vmatpush1.bf16.msra.mxu1 %v3761_v58  ;;  %v3820_v57 = vld [vmem:[#allocation7 + $0x264] ss:$16 sps:$4 sm:$0xff]   ;;  %v3823_v58 = vld [vmem:[#allocation7 + $0x26c] ss:$16 sps:$4 sm:$0xff]  }
 0x13d   :  { %2443 = vmatprep.subr.bf16.mxu0 %v3766_v59  ;;  %2525 = vmatprep.subr.bf16.mxu1 %v3769_v60  ;;  %v3818_v59 = vld [vmem:[#allocation7 + $0x260] ss:$16 sps:$4 sm:$0xff]   ;;  %v3821_v60 = vld [vmem:[#allocation7 + $0x268] ss:$16 sps:$4 sm:$0xff]  }
 0x140   :  { %2444 = vmatpush1.bf16.msra.mxu0 %v3764_v61  ;;  %2526 = vmatpush1.bf16.msra.mxu1 %v3767_v62  ;;  %v3826_v61 = vld [vmem:[#allocation7 + $0x284] ss:$16 sps:$4 sm:$0xff]   ;;  %v3829_v62 = vld [vmem:[#allocation7 + $0x28c] ss:$16 sps:$4 sm:$0xff]  }
 0x141   :  { %2445 = vmatprep.subr.bf16.mxu0 %v3772_v63  ;;  %2527 = vmatprep.subr.bf16.mxu1 %v3775_v0  ;;  %v3824_v63 = vld [vmem:[#allocation7 + $0x280] ss:$16 sps:$4 sm:$0xff]   ;;  %v3827_v0 = vld [vmem:[#allocation7 + $0x288] ss:$16 sps:$4 sm:$0xff]  }
 0x144   :  { %2446 = vmatpush1.bf16.msra.mxu0 %v3770_v1  ;;  %2528 = vmatpush1.bf16.msra.mxu1 %v3773_v2  ;;  %v3832_v1 = vld [vmem:[#allocation7 + $0x2a4] ss:$16 sps:$4 sm:$0xff]   ;;  %v3835_v2 = vld [vmem:[#allocation7 + $0x2ac] ss:$16 sps:$4 sm:$0xff]  }
 0x145   :  { %2447 = vmatprep.subr.bf16.mxu0 %v3778_v3  ;;  %2529 = vmatprep.subr.bf16.mxu1 %v3781_v4  ;;  %v3830_v3 = vld [vmem:[#allocation7 + $0x2a0] ss:$16 sps:$4 sm:$0xff]   ;;  %v3833_v4 = vld [vmem:[#allocation7 + $0x2a8] ss:$16 sps:$4 sm:$0xff]  }
 0x148   :  { %2448 = vmatpush1.bf16.msra.mxu0 %v3776_v5  ;;  %2530 = vmatpush1.bf16.msra.mxu1 %v3779_v6  ;;  %v3838_v5 = vld [vmem:[#allocation7 + $0x2c4] ss:$16 sps:$4 sm:$0xff]   ;;  %v3841_v6 = vld [vmem:[#allocation7 + $0x2cc] ss:$16 sps:$4 sm:$0xff]  }
 0x149   :  { %2449 = vmatprep.subr.bf16.mxu0 %v3784_v7  ;;  %2531 = vmatprep.subr.bf16.mxu1 %v3787_v8  ;;  %v3836_v7 = vld [vmem:[#allocation7 + $0x2c0] ss:$16 sps:$4 sm:$0xff]   ;;  %v3839_v8 = vld [vmem:[#allocation7 + $0x2c8] ss:$16 sps:$4 sm:$0xff]  }
 0x14c   :  { %2450 = vmatpush1.bf16.msra.mxu0 %v3782_v9  ;;  %2532 = vmatpush1.bf16.msra.mxu1 %v3785_v10  ;;  %v3844_v9 = vld [vmem:[#allocation7 + $0x2e4] ss:$16 sps:$4 sm:$0xff]   ;;  %v3847_v10 = vld [vmem:[#allocation7 + $0x2ec] ss:$16 sps:$4 sm:$0xff]  }
 0x14d   :  { %2451 = vmatprep.subr.bf16.mxu0 %v3790_v11  ;;  %2533 = vmatprep.subr.bf16.mxu1 %v3793_v12  ;;  %v3842_v11 = vld [vmem:[#allocation7 + $0x2e0] ss:$16 sps:$4 sm:$0xff]   ;;  %v3845_v12 = vld [vmem:[#allocation7 + $0x2e8] ss:$16 sps:$4 sm:$0xff]  }
 0x150   :  { %2452 = vmatpush1.bf16.msra.mxu0 %v3788_v13  ;;  %2534 = vmatpush1.bf16.msra.mxu1 %v3791_v14  ;;  %v3850_v13 = vld [vmem:[#allocation7 + $0x304] ss:$16 sps:$4 sm:$0xff]   ;;  %v3853_v14 = vld [vmem:[#allocation7 + $0x30c] ss:$16 sps:$4 sm:$0xff]  }
 0x151   :  { %2453 = vmatprep.subr.bf16.mxu0 %v3796_v15  ;;  %2535 = vmatprep.subr.bf16.mxu1 %v3799_v16  ;;  %v3848_v15 = vld [vmem:[#allocation7 + $0x300] ss:$16 sps:$4 sm:$0xff]   ;;  %v3851_v16 = vld [vmem:[#allocation7 + $0x308] ss:$16 sps:$4 sm:$0xff]  }
 0x154   :  { %2454 = vmatpush1.bf16.msra.mxu0 %v3794_v17  ;;  %2536 = vmatpush1.bf16.msra.mxu1 %v3797_v18  ;;  %v3856_v17 = vld [vmem:[#allocation7 + $0x324] ss:$16 sps:$4 sm:$0xff]   ;;  %v3859_v18 = vld [vmem:[#allocation7 + $0x32c] ss:$16 sps:$4 sm:$0xff]  }
 0x155   :  { %2464 = vmatprep.subr.bf16.mxu0 %v3802_v19  ;;  %2546 = vmatprep.subr.bf16.mxu1 %v3805_v20  ;;  %v3854_v19 = vld [vmem:[#allocation7 + $0x320] ss:$16 sps:$4 sm:$0xff]   ;;  %v3857_v20 = vld [vmem:[#allocation7 + $0x328] ss:$16 sps:$4 sm:$0xff]  }
 0x1ea   :  { %v1454_v30 = vpop.f32.mrb[0].mxu0  ;;  %v4169_v31 = vpop.f32.mrb[0].mxu1 }
 0x1eb   :  { %v3360_v32 = vadd.f32 %v1454_v30, %v296_v27  ;;  %v1456_v33 = vpop.f32.mrb[1].mxu0  ;;  %v1620_v34 = vpop.f32.mrb[1].mxu1  ;;  %v3865_v27 = vld [vmem:[#allocation7 + $0x34c] ss:$16 sps:$4 sm:$0xff]   ;;  %v3868_v30 = vld [vmem:[#allocation7 + $0x364] ss:$16 sps:$4 sm:$0xff]  }
 0x1ec   :  { %v3361_v35 = vadd.f32 %v1456_v33, %v300_v28  ;;  %v3363_v36 = vadd.f32 %v1620_v34, %v308_v29  ;;  %v1458_v37 = vpop.f32.mrb[2].mxu0  ;;  %v1622_v38 = vpop.f32.mrb[2].mxu1  ;;  %v3860_v28 = vld [vmem:[#allocation7 + $0x340] ss:$16 sps:$4 sm:$0xff]   ;;  %v3863_v29 = vld [vmem:[#allocation7 + $0x348] ss:$16 sps:$4 sm:$0xff]  }
 0x1ed   :  { %v1625_v39 = vmax.f32 %v3360_v32, 0.0  ;;  %v1459_v40 = vpop.f32.mrb[3].mxu0  ;;  %v1623_v41 = vpop.f32.mrb[3].mxu1  ;;  %v3871_v32 = vld [vmem:[#allocation7 + $0x36c] ss:$16 sps:$4 sm:$0xff]  }
 0x1ee   :  { %v1626_v42 = vmax.f32 %v3361_v35, 0.0  ;;  %v1628_v43 = vmax.f32 %v3363_v36, 0.0  ;;  %v3866_v33 = vld [vmem:[#allocation7 + $0x360] ss:$16 sps:$4 sm:$0xff]   ;;  %v3869_v34 = vld [vmem:[#allocation7 + $0x368] ss:$16 sps:$4 sm:$0xff]  }
 0x1ef   :  { %v1629_v47 = vpack.c.bf16 %v1625_v39, %v1625_v39  ;;  %v3874_v35 = vld [vmem:[#allocation7 + $0x384] ss:$16 sps:$4 sm:$0xff]   ;;  %v3877_v36 = vld [vmem:[#allocation7 + $0x38c] ss:$16 sps:$4 sm:$0xff]   ;;  %v3872_v37 = vld [vmem:[#allocation7 + $0x380] ss:$16 sps:$4 sm:$0xff]  }
 0x1f0   :  { %v1630_v44 = vpack.c.bf16 %v1626_v42, %v1626_v42  ;;  %v1632_v50 = vpack.c.bf16 %v1628_v43, %v1628_v43  ;;  %v3875_v38 = vld [vmem:[#allocation7 + $0x388] ss:$16 sps:$4 sm:$0xff]   ;;  %v303_v39 = vsub.s32 2, %v4150_v22  ;;  %v3880_v40 = vld [vmem:[#allocation7 + $0x3a4] ss:$16 sps:$4 sm:$0xff]  }
 0x1f1   :  { %v3883_v41 = vld [vmem:[#allocation7 + $0x3ac] ss:$16 sps:$4 sm:$0xff]   ;;  %v3878_v42 = vld [vmem:[#allocation7 + $0x3a0] ss:$16 sps:$4 sm:$0xff]   ;;  %v3881_v43 = vld [vmem:[#allocation7 + $0x3a8] ss:$16 sps:$4 sm:$0xff]  }
 0x1f2   :  { %2455 = vmatprep.mubr.bf16.mxu0 %v1630_v44  ;;  %2537 = vmatprep.mubr.bf16.mxu1 %v1630_v44  ;;  %v304_v44 = vrot.slane %v4156_v24, %v303_v39  ;;  %v3896_v24 = vld [vmem:[#allocation8 + $0x40] sm:$0xff]  }
 0x1f3   :  { %2456 = vmatmul.mubr.bf16.vlgmr.msra.gmra.mrb[4].mxu0 %v1629_v47  ;;  %2538 = vmatmul.mubr.bf16.vlgmr.msra.gmra.mrb[4].mxu1 %v1629_v47  ;;  %v3884_v47 = vld [vmem:[#allocation7 + $0x3c0] ss:$16 sps:$4 sm:$0xff]  }
 0x1f4   :  { %2465 = vmatpush1.bf16.msra.mxu0 %v3800_v45  ;;  %2547 = vmatpush1.bf16.msra.mxu1 %v3803_v46  ;;  %v3886_v45 = vld [vmem:[#allocation7 + $0x3c4] ss:$16 sps:$4 sm:$0xff]   ;;  %v3889_v46 = vld [vmem:[#allocation7 + $0x3cc] ss:$16 sps:$4 sm:$0xff]  }
 0x1f5   :  { %2496 = vmatprep.mubr.bf16.mxu0 %v1632_v50  ;;  %2578 = vmatprep.mubr.bf16.mxu1 %v1632_v50  ;;  %v3892_v50 = vld [vmem:[#allocation7 + $0x3e4] ss:$16 sps:$4 sm:$0xff]  }
 0x1f6   :  { %2466 = vmatprep.subr.bf16.mxu0 %v3808_v48  ;;  %2548 = vmatprep.subr.bf16.mxu1 %v3811_v49  ;;  %v3887_v48 = vld [vmem:[#allocation7 + $0x3c8] ss:$16 sps:$4 sm:$0xff]   ;;  %v3362_v49 = vadd.f32 %v4169_v31, %v304_v44 }
 0x1f7   :  { %v3900_v31 = vld [vmem:[#allocation8 + $0x48] sm:$0xff]  }
 0x1f8   :  { %2467 = vmatpush1.bf16.msra.mxu0 %v3806_v51  ;;  %2549 = vmatpush1.bf16.msra.mxu1 %v3809_v52  ;;  %v3895_v51 = vld [vmem:[#allocation7 + $0x3ec] ss:$16 sps:$4 sm:$0xff]   ;;  %v3890_v52 = vld [vmem:[#allocation7 + $0x3e0] ss:$16 sps:$4 sm:$0xff]  }
 0x1f9   :  { %2468 = vmatprep.subr.bf16.mxu0 %v3814_v53  ;;  %2550 = vmatprep.subr.bf16.mxu1 %v3817_v54  ;;  %v3893_v53 = vld [vmem:[#allocation7 + $0x3e8] ss:$16 sps:$4 sm:$0xff]   ;;  %v1627_v54 = vmax.f32 %v3362_v49, 0.0 }
 0x1fc   :  { %2469 = vmatpush1.bf16.msra.mxu0 %v3812_v55  ;;  %2551 = vmatpush1.bf16.msra.mxu1 %v3815_v56  ;;  %v3897_v55 = vld [vmem:[#allocation8 + $0xc0] sm:$0xff]  }
 0x1fd   :  { %2470 = vmatprep.subr.bf16.mxu0 %v3820_v57  ;;  %2552 = vmatprep.subr.bf16.mxu1 %v3823_v58  ;;  %v3898_v56 = vld [vmem:[#allocation8] sm:$0xff]   ;;  %v1631_v58 = vpack.c.bf16 %v1627_v54, %v1627_v54 }
 0x1fe   :  { %v3899_v57 = vld [vmem:[#allocation8 + $0x80] sm:$0xff]  }
 0x200   :  { %2471 = vmatpush1.bf16.msra.mxu0 %v3818_v59  ;;  %2553 = vmatpush1.bf16.msra.mxu1 %v3821_v60  ;;  %v3901_v59 = vld [vmem:[#allocation8 + $0xc8] sm:$0xff]  }
 0x201   :  { %2472 = vmatprep.subr.bf16.mxu0 %v3826_v61  ;;  %2554 = vmatprep.subr.bf16.mxu1 %v3829_v62  ;;  %v3902_v60 = vld [vmem:[#allocation8 + $0x8] sm:$0xff]   ;;  %v3904_v62 = vld [vmem:[#allocation8 + $0x50] sm:$0xff]  }
 0x202   :  { %v3903_v61 = vld [vmem:[#allocation8 + $0x88] sm:$0xff]  }
 0x204   :  { %2473 = vmatpush1.bf16.msra.mxu0 %v3824_v63  ;;  %2555 = vmatpush1.bf16.msra.mxu1 %v3827_v0  ;;  %v3905_v63 = vld [vmem:[#allocation8 + $0xd0] sm:$0xff]  }
 0x205   :  { %2474 = vmatprep.subr.bf16.mxu0 %v3832_v1  ;;  %2556 = vmatprep.subr.bf16.mxu1 %v3835_v2  ;;  %v3906_v0 = vld [vmem:[#allocation8 + $0x10] sm:$0xff]   ;;  %v3908_v2 = vld [vmem:[#allocation8 + $0x58] sm:$0xff]  }
 0x206   :  { %v3907_v1 = vld [vmem:[#allocation8 + $0x90] sm:$0xff]  }
 0x208   :  { %2475 = vmatpush1.bf16.msra.mxu0 %v3830_v3  ;;  %2557 = vmatpush1.bf16.msra.mxu1 %v3833_v4  ;;  %v3909_v3 = vld [vmem:[#allocation8 + $0xd8] sm:$0xff]  }
 0x209   :  { %2476 = vmatprep.subr.bf16.mxu0 %v3838_v5  ;;  %2558 = vmatprep.subr.bf16.mxu1 %v3841_v6  ;;  %v3910_v4 = vld [vmem:[#allocation8 + $0x18] sm:$0xff]   ;;  %v3912_v6 = vld [vmem:[#allocation8 + $0x60] sm:$0xff]  }
 0x20a   :  { %v3911_v5 = vld [vmem:[#allocation8 + $0x98] sm:$0xff]  }
 0x20c   :  { %2477 = vmatpush1.bf16.msra.mxu0 %v3836_v7  ;;  %2559 = vmatpush1.bf16.msra.mxu1 %v3839_v8  ;;  %v3913_v7 = vld [vmem:[#allocation8 + $0xe0] sm:$0xff]  }
 0x20d   :  { %2478 = vmatprep.subr.bf16.mxu0 %v3844_v9  ;;  %2560 = vmatprep.subr.bf16.mxu1 %v3847_v10  ;;  %v3914_v8 = vld [vmem:[#allocation8 + $0x20] sm:$0xff]   ;;  %v3916_v10 = vld [vmem:[#allocation8 + $0x68] sm:$0xff]  }
 0x20e   :  { %v3915_v9 = vld [vmem:[#allocation8 + $0xa0] sm:$0xff]  }
 0x210   :  { %2479 = vmatpush1.bf16.msra.mxu0 %v3842_v11  ;;  %2561 = vmatpush1.bf16.msra.mxu1 %v3845_v12  ;;  %v3917_v11 = vld [vmem:[#allocation8 + $0xe8] sm:$0xff]  }
 0x211   :  { %2480 = vmatprep.subr.bf16.mxu0 %v3850_v13  ;;  %2562 = vmatprep.subr.bf16.mxu1 %v3853_v14  ;;  %v3918_v12 = vld [vmem:[#allocation8 + $0x28] sm:$0xff]   ;;  %v3920_v14 = vld [vmem:[#allocation8 + $0x70] sm:$0xff]  }
 0x212   :  { %v3919_v13 = vld [vmem:[#allocation8 + $0xa8] sm:$0xff]  }
 0x214   :  { %2481 = vmatpush1.bf16.msra.mxu0 %v3848_v15  ;;  %2563 = vmatpush1.bf16.msra.mxu1 %v3851_v16  ;;  %v3921_v15 = vld [vmem:[#allocation8 + $0xf0] sm:$0xff]  }
 0x215   :  { %2482 = vmatprep.subr.bf16.mxu0 %v3856_v17  ;;  %2564 = vmatprep.subr.bf16.mxu1 %v3859_v18  ;;  %v3922_v16 = vld [vmem:[#allocation8 + $0x30] sm:$0xff]   ;;  %v3924_v18 = vld [vmem:[#allocation8 + $0x78] sm:$0xff]  }
 0x216   :  { %v3923_v17 = vld [vmem:[#allocation8 + $0xb0] sm:$0xff]  }
 0x218   :  { %2483 = vmatpush1.bf16.msra.mxu0 %v3854_v19  ;;  %2565 = vmatpush1.bf16.msra.mxu1 %v3857_v20  ;;  %v3925_v19 = vld [vmem:[#allocation8 + $0xf8] sm:$0xff]  }
 0x219   :  { %2484 = vmatprep.subr.bf16.mxu0 %v3862_v21  ;;  %2566 = vmatprep.subr.bf16.mxu1 %v3865_v27  ;;  %v3926_v20 = vld [vmem:[#allocation8 + $0x38] sm:$0xff]   ;;  %v1761_v27 = vld [vmem:[%s4206_s4] sm:$0xf] }
 0x21a   :  { %v3927_v21 = vld [vmem:[#allocation8 + $0xb8] sm:$0xff]  }
 0x21c   :  { %2485 = vmatpush1.bf16.msra.mxu0 %v3860_v28  ;;  %2567 = vmatpush1.bf16.msra.mxu1 %v3863_v29  ;;  %v1766_v28 = vrot.slane %v1761_v27, %v295_v23  ;;  %v1774_v29 = vrot.slane %v1761_v27, %v303_v39 }
 0x21d   :  { %2486 = vmatprep.subr.bf16.mxu0 %v3868_v30  ;;  %2568 = vmatprep.subr.bf16.mxu1 %v3871_v32  ;;  %v1770_v30 = vrot.slane %v1761_v27, %v299_v25  ;;  %v1778_v32 = vrot.slane %v1761_v27, %v307_v26 }
 0x220   :  { %2487 = vmatpush1.bf16.msra.mxu0 %v3866_v33  ;;  %2569 = vmatpush1.bf16.msra.mxu1 %v3869_v34 }
 0x221   :  { %2488 = vmatprep.subr.bf16.mxu0 %v3874_v35  ;;  %2570 = vmatprep.subr.bf16.mxu1 %v3877_v36 }
 0x224   :  { %2489 = vmatpush1.bf16.msra.mxu0 %v3872_v37  ;;  %2571 = vmatpush1.bf16.msra.mxu1 %v3875_v38 }
 0x225   :  { %2490 = vmatprep.subr.bf16.mxu0 %v3880_v40  ;;  %2572 = vmatprep.subr.bf16.mxu1 %v3883_v41 }
 0x228   :  { %2491 = vmatpush1.bf16.msra.mxu0 %v3878_v42  ;;  %2573 = vmatpush1.bf16.msra.mxu1 %v3881_v43 }
 0x229   :  { %2492 = vmatprep.subr.bf16.mxu0 %v3886_v45  ;;  %2574 = vmatprep.subr.bf16.mxu1 %v3889_v46 }
 0x22c   :  { %2493 = vmatpush1.bf16.msra.mxu0 %v3884_v47  ;;  %2575 = vmatpush1.bf16.msra.mxu1 %v3887_v48 }
 0x22d   :  { %2494 = vmatprep.subr.bf16.mxu0 %v3892_v50  ;;  %2576 = vmatprep.subr.bf16.mxu1 %v3895_v51  ;;  %v3283_v51 = vld [vmem:[%s4208_s6] ss:$0 sm:$0xff] }
 0x230   :  { %2495 = vmatpush1.bf16.msra.mxu0 %v3890_v52  ;;  %2577 = vmatpush1.bf16.msra.mxu1 %v3893_v53 }
 0x231   :  { %3316 = vmatprep.subr.bf16.mxu0 %v3896_v24  ;;  %3338 = vmatprep.subr.bf16.mxu1 %v3897_v55 }
 0x233   :  { %2497 = vmatmul.mubr.bf16.vlgmr.msra.gmra.mrb[4].mxu0 %v1631_v58  ;;  %2579 = vmatmul.mubr.bf16.vlgmr.msra.gmra.mrb[4].mxu1 %v1631_v58 }
 0x234   :  { %3317 = vmatpush3.bf16.msra.mxu0 %v3898_v56  ;;  %3339 = vmatpush3.bf16.msra.mxu1 %v3899_v57 }
 0x235   :  { %3318 = vmatprep.subr.bf16.mxu0 %v3900_v31  ;;  %3340 = vmatprep.subr.bf16.mxu1 %v3901_v59 }
 0x238   :  { %3319 = vmatpush3.bf16.msra.mxu0 %v3902_v60  ;;  %3341 = vmatpush3.bf16.msra.mxu1 %v3903_v61 }
 0x239   :  { %3320 = vmatprep.subr.bf16.mxu0 %v3904_v62  ;;  %3342 = vmatprep.subr.bf16.mxu1 %v3905_v63 }
 0x23c   :  { %3321 = vmatpush3.bf16.msra.mxu0 %v3906_v0  ;;  %3343 = vmatpush3.bf16.msra.mxu1 %v3907_v1 }
 0x23d   :  { %3322 = vmatprep.subr.bf16.mxu0 %v3908_v2  ;;  %3344 = vmatprep.subr.bf16.mxu1 %v3909_v3 }
 0x240   :  { %3323 = vmatpush3.bf16.msra.mxu0 %v3910_v4  ;;  %3345 = vmatpush3.bf16.msra.mxu1 %v3911_v5 }
 0x241   :  { %3324 = vmatprep.subr.bf16.mxu0 %v3912_v6  ;;  %3346 = vmatprep.subr.bf16.mxu1 %v3913_v7 }
 0x244   :  { %3325 = vmatpush3.bf16.msra.mxu0 %v3914_v8  ;;  %3347 = vmatpush3.bf16.msra.mxu1 %v3915_v9 }
 0x245   :  { %3326 = vmatprep.subr.bf16.mxu0 %v3916_v10  ;;  %3348 = vmatprep.subr.bf16.mxu1 %v3917_v11 }
 0x248   :  { %3327 = vmatpush3.bf16.msra.mxu0 %v3918_v12  ;;  %3349 = vmatpush3.bf16.msra.mxu1 %v3919_v13 }
 0x249   :  { %3328 = vmatprep.subr.bf16.mxu0 %v3920_v14  ;;  %3350 = vmatprep.subr.bf16.mxu1 %v3921_v15 }
 0x24c   :  { %3329 = vmatpush3.bf16.msra.mxu0 %v3922_v16  ;;  %3351 = vmatpush3.bf16.msra.mxu1 %v3923_v17 }
 0x24d   :  { %3330 = vmatprep.subr.bf16.mxu0 %v3924_v18  ;;  %3352 = vmatprep.subr.bf16.mxu1 %v3925_v19 }
 0x250   :  { %3331 = vmatpush3.bf16.msra.mxu0 %v3926_v20  ;;  %3353 = vmatpush3.bf16.msra.mxu1 %v3927_v21 }
 0x306   :  { %v2498_v33 = vpop.f32.mrb[4].mxu0  ;;  %v2580_v34 = vpop.f32.mrb[4].mxu1 }
 0x307   :  { %v3364_v35 = vadd.f32 %v2498_v33, %v1766_v28  ;;  %v3366_v36 = vadd.f32 %v2580_v34, %v1774_v29  ;;  %v2500_v37 = vpop.f32.mrb[5].mxu0  ;;  %v2582_v38 = vpop.f32.mrb[5].mxu1 }
 0x308   :  { %v3365_v40 = vadd.f32 %v2500_v37, %v1770_v30  ;;  %v3367_v41 = vadd.f32 %v2582_v38, %v1778_v32  ;;  %v2502_v42 = vpop.f32.mrb[6].mxu0  ;;  %v2584_v43 = vpop.f32.mrb[6].mxu1 }
 0x309   :  { %v2587_v23 = vmax.f32 %v3364_v35, 0.0  ;;  %v2589_v44 = vmax.f32 %v3366_v36, 0.0  ;;  %v2503_v45 = vpop.f32.mrb[7].mxu0  ;;  %v2585_v39 = vpop.f32.mrb[7].mxu1 }
 0x30a   :  { %v2588_v46 = vmax.f32 %v3365_v40, 0.0  ;;  %v2590_v47 = vmax.f32 %v3367_v41, 0.0 }
 0x30b   :  { %v2591_v22 = vpack.c.bf16 %v2587_v23, %v2587_v23  ;;  %v2593_v26 = vpack.c.bf16 %v2589_v44, %v2589_v44 }
 0x30c   :  { %v2592_v25 = vpack.c.bf16 %v2588_v46, %v2588_v46  ;;  %v2594_v48 = vpack.c.bf16 %v2590_v47, %v2590_v47 }
 0x30e   :  { %2890 = vmatprep.mubr.bf16.mxu0 %v2592_v25  ;;  %2930 = vmatprep.mubr.bf16.mxu1 %v2594_v48 }
 0x30f   :  { %2891 = vmatmul.mubr.bf16.vlgmr.msra.gmra.mrb[8].mxu0 %v2591_v22  ;;  %2931 = vmatmul.mubr.bf16.vlgmr.msra.gmra.mrb[8].mxu1 %v2593_v26 }
 0x3e2   :  { %v3332_v49 = vpop.f32.mrb[8].mxu0  ;;  %v3354_v50 = vpop.f32.mrb[8].mxu1 }
 0x3e3   :  { %v3333_v52 = vpop.f32.mrb[9].mxu0  ;;  %v3355_v53 = vpop.f32.mrb[9].mxu1 }
 0x3e4   :  { %v3334_v54 = vadd.f32 %v3333_v52, %v3332_v49  ;;  %v3356_v24 = vadd.f32 %v3355_v53, %v3354_v50  ;;  %v3335_v55 = vpop.f32.mrb[10].mxu0  ;;  %v3357_v56 = vpop.f32.mrb[10].mxu1 }
 0x3e5   :  { %v3336_v57 = vpop.f32.mrb[11].mxu0  ;;  %v3358_v58 = vpop.f32.mrb[11].mxu1 }
 0x3e6   :  { %v2893_v31 = vadd.f32 %v3334_v54, %v3283_v51 }
 0x3e8   :  { %v2933_v59 = vadd.f32 %v3356_v24, %v2893_v31 }
 0x3ea   :  { %v2938_v60 = vpack.c.bf16 %v2933_v59, %v2933_v59 }
 0x3ec   :  { %2939 = vst [vmem:[#allocation10] sm:$0xf] %v2938_v60 }
 0x3ed   :  { %4027 = shalt.err (!%p4024_p8)
}
 0x3ee   :  { %s4028_s10 = scalar_lea.hbm %s4209_s7, 64 }
 0x3ef   :  { %p4029_p9 = scmp.ne.s32.totalorder %s4209_s7, %s4028_s10  ;;  %p4032_p10 = scmp.lt.u32.totalorder %s4028_s10, %s4209_s7 }
 0x3f1   :  { %p4034_p11 = pnand %p4032_p10, %p4029_p9 }
 0x3f3   :  { %4037 = shalt.err (!%p4034_p11)
}
 0x3f4   :  { %2949 = dma.vmem_to_hbm [thread:$0]  %s2947_s30, 64, %s4209_s7, [#allocation4]  }
 0x3f5   :  { %4044 = dma.done.wait [#allocation4], 64  }
 0x3f6   :  { %4045 = vsyncadd [#allocation4], 4294967232 }
 0x3f7   :  { %2953 = vsyncpa [#allocation3], 1 }
 0x3f8   :  { %2954 = vsyncpa [#allocation6], 1 }
 0x3f9   :  { %2955 = vsyncpa [#allocation9], 1 }
 0x3fa   :  { %2956 = vsyncpa [#allocation4], 1 }

</bundles_post_ra>
